<compile_context>
chip_gen: v7x
topology: tpu7x:2x2x1
jax: 0.10.0
libtpu: 0.0.40
codegen_flags: <defaults>
</compile_context>

<pallas_src>
import functools

import jax
import jax.numpy as jnp
import numpy as np
from jax import lax
from jax.experimental import pallas as pl
from jax.experimental.pallas import tpu as pltpu

_EPS = 1e-5
_TAPS = tuple((dy, dx) for dy in (-1, 0, 1) for dx in (-1, 0, 1))
_OFF_TAPS = tuple(t for t in _TAPS if t != (0, 0))


def _round_up(x, m):
    return (x + m - 1) // m * m


# ---------------------------------------------------------------------------
# Fully fused `up` kernel:
#   bilinear x2 upsample  +  (concat -> split-K)  +  2x (conv3x3 + BN + ReLU)
# ---------------------------------------------------------------------------
def _up_fused_kernel(x1_ref, x2_ref, ut_ref, masks_ref,
                     w1x2_ref, w1x1_ref, s1_ref, w2_ref, s2_ref,
                     o_ref, *, B, H, W):
    # x1_ref:    (B, C1_p, H1*W1)   skip-path input, pre-upsample
    # x2_ref:    (B, C2_p, H*W)     already at target resolution
    # ut_ref:    (H1*W1, H*W)       bilinear interp matrix, kron(A_h, A_w)^T
    # masks_ref: (8, 1, B*H*W)      0/1 validity masks for off-center taps
    # w1x2/w1x1: (Cout_p, 9*C_p)    BN-folded conv1 weights, split along cin
    # w2:        (Cout_p, 9*Cout_p) BN-folded conv2 weights
    # s1/s2:     (Cout_p, 1)        BN-folded shifts
    # o_ref:     (B, Cout_p, H*W)
    HW = H * W
    BHW = B * HW
    masks = masks_ref[...]                       # (8, 1, B*HW)

    def im2col(x_cf):
        # x_cf: (C, B*HW) -> (9*C, B*HW); XLU rolls + per-image boundary masks
        pieces = []
        t = 0
        for dy, dx in _TAPS:
            if dy == 0 and dx == 0:
                pieces.append(x_cf)
            else:
                off = dy * W + dx                # flat index offset of this tap
                shifted = pltpu.roll(x_cf, (-off) % BHW, axis=1)
                pieces.append(shifted * masks[t])  # zero halo / cross-image
                t += 1
        return jnp.concatenate(pieces, axis=0)

    # --- bilinear upsample (align_corners=True): one interp matmul per image,
    #     then fold the batch onto the lane axis -> (C1_p, B*HW)
    x1_up = jnp.concatenate(
        [jnp.dot(x1_ref[b], ut_ref[...], preferred_element_type=jnp.float32)
         for b in range(B)], axis=1)
    # --- x2 is already at target resolution; fold batch onto lanes
    x2_cf = jnp.concatenate([x2_ref[b] for b in range(B)], axis=1)

    # --- conv1 + BN + ReLU.  cat([x2, x1], dim=1) is realised as a K-split of
    #     the folded weights + two accumulating MXU matmuls (no concat tensor).
    acc = jnp.dot(w1x2_ref[...], im2col(x2_cf),
                  preferred_element_type=jnp.float32)
    acc = acc + jnp.dot(w1x1_ref[...], im2col(x1_up),
                        preferred_element_type=jnp.float32)
    y = jnp.maximum(acc + s1_ref[...], 0.0)      # (Cout_p, B*HW)

    # --- conv2 + BN + ReLU
    acc2 = jnp.dot(w2_ref[...], im2col(y), preferred_element_type=jnp.float32)
    y2 = jnp.maximum(acc2 + s2_ref[...], 0.0)

    for b in range(B):                           # lane-dense (HW-wide) stores
        o_ref[b] = y2[:, b * HW:(b + 1) * HW]


def up_fused(x1_cf, x2_cf, u_t, masks, w1x2, w1x1, s1, w2, s2, *, H, W, B):
    """x1_cf: (N, C1_p, H1*W1), x2_cf: (N, C2_p, H*W) -> (N, Cout_p, H*W)."""
    N, c1p, hw1 = x1_cf.shape
    _, c2p, hw = x2_cf.shape
    coutp = w2.shape[0]
    kernel = functools.partial(_up_fused_kernel, B=B, H=H, W=W)
    return pl.pallas_call(
        kernel,
        out_shape=jax.ShapeDtypeStruct((N, coutp, hw), jnp.float32),
        grid_spec=pltpu.PrefetchScalarGridSpec(
            num_scalar_prefetch=0,
            grid=(N // B,),
            in_specs=[
                pl.BlockSpec((B, c1p, hw1), lambda g: (g, 0, 0)),
                pl.BlockSpec((B, c2p, hw), lambda g: (g, 0, 0)),
                pl.BlockSpec(u_t.shape, lambda g: (0, 0)),
                pl.BlockSpec(masks.shape, lambda g: (0, 0, 0)),
                pl.BlockSpec(w1x2.shape, lambda g: (0, 0)),
                pl.BlockSpec(w1x1.shape, lambda g: (0, 0)),
                pl.BlockSpec(s1.shape, lambda g: (0, 0)),
                pl.BlockSpec(w2.shape, lambda g: (0, 0)),
                pl.BlockSpec(s2.shape, lambda g: (0, 0)),
            ],
            out_specs=pl.BlockSpec((B, coutp, hw), lambda g: (g, 0, 0)),
        ),
        compiler_params=pltpu.CompilerParams(
            dimension_semantics=("parallel",)),
        # TODO(synk): set vmem_limit_bytes + spatial row-tiling before scaling
        #             to realistic decoder sizes (v7x has only 64 MiB VMEM).
    )(x1_cf, x2_cf, u_t, masks, w1x2, w1x1, s1, w2, s2)


# ---------------------------------------------------------------------------
# Trace-time constant helpers (numpy -> device constants)
# ---------------------------------------------------------------------------
def _tap_masks(H, W, B):
    """0/1 validity mask per off-center 3x3 tap, tiled per image (flat layout)."""
    yy, xx = np.meshgrid(np.arange(H), np.arange(W), indexing="ij")
    yy = yy.reshape(-1)
    xx = xx.reshape(-1)
    m = np.zeros((len(_OFF_TAPS), 1, H * W), np.float32)
    for t, (dy, dx) in enumerate(_OFF_TAPS):
        ok = (yy + dy >= 0) & (yy + dy < H) & (xx + dx >= 0) & (xx + dx < W)
        m[t, 0, :] = ok.astype(np.float32)
    return jnp.asarray(np.tile(m, (1, 1, B)))


def _interp_matrix_align_corners_np(n_in, n_out):
    """(n_out, n_in) bilinear interpolation matrix, align_corners=True."""
    A = np.zeros((n_out, n_in), np.float32)
    if n_in == 1:
        A[:, 0] = 1.0
        return A
    src = np.arange(n_out, dtype=np.float64) * (n_in - 1) / (n_out - 1)
    lo = np.clip(np.floor(src).astype(np.int64), 0, n_in - 2)
    frac = src - lo
    A[np.arange(n_out), lo] += (1.0 - frac).astype(np.float32)
    A[np.arange(n_out), lo + 1] += frac.astype(np.float32)
    return A


def _upsample2x_matrix(H1, W1):
    """(H1*W1, 4*H1*W1) matrix U^T such that flat(up2x(img)) = flat(img) @ U^T."""
    A_h = _interp_matrix_align_corners_np(H1, 2 * H1)
    A_w = _interp_matrix_align_corners_np(W1, 2 * W1)
    return jnp.asarray(np.ascontiguousarray(np.kron(A_h, A_w).T))


def _fold_conv_bn(w_hwio, b, gamma, beta, mean, var, cin_splits, cout_p):
    """Fold conv bias + inference BN; split weights along cin into matrices.

    cin_splits: list of (start, size, padded_size) along the input-channel dim.
    Returns ([ (cout_p, 9*padded_size) matrices ], (cout_p, 1) shift column).
    """
    scale = gamma / jnp.sqrt(var + _EPS)                       # (Cout,)
    shift = (b - mean) * scale + beta                          # (Cout,)
    wf = w_hwio * scale[None, None, None, :]                   # (3,3,Cin,Cout)
    cout = w_hwio.shape[3]
    mats = []
    for (start, size, size_p) in cin_splits:
        wp = wf[:, :, start:start + size, :]
        wp = jnp.pad(wp, ((0, 0), (0, 0),
                          (0, size_p - size), (0, cout_p - cout)))
        mats.append(jnp.transpose(wp, (3, 0, 1, 2)).reshape(cout_p, 9 * size_p))
    s_col = jnp.pad(shift, (0, cout_p - cout)).reshape(cout_p, 1)
    return mats, s_col


# ---------------------------------------------------------------------------
# Parameters (deterministic, synthetic) -- raw PyTorch-style params
# ---------------------------------------------------------------------------
def make_params(key, in_ch, out_ch):
    ks = jax.random.split(key, 12)

    def conv(kw, kb, cin, cout):
        w = jax.random.normal(kw, (3, 3, cin, cout), jnp.float32) * 0.1  # HWIO
        b = jax.random.normal(kb, (cout,), jnp.float32) * 0.05
        return w, b

    def bn(kg, kb, km, kv, c):
        gamma = 1.0 + 0.1 * jax.random.normal(kg, (c,), jnp.float32)
        beta = 0.1 * jax.random.normal(kb, (c,), jnp.float32)
        mean = 0.1 * jax.random.normal(km, (c,), jnp.float32)
        var = jax.random.uniform(kv, (c,), jnp.float32, minval=0.5, maxval=1.5)
        return gamma, beta, mean, var

    w1, b1 = conv(ks[0], ks[1], in_ch, out_ch)
    g1, be1, m1, v1 = bn(ks[2], ks[3], ks[4], ks[5], out_ch)
    w2, b2 = conv(ks[6], ks[7], out_ch, out_ch)
    g2, be2, m2, v2 = bn(ks[8], ks[9], ks[10], ks[11], out_ch)
    return dict(w1=w1, b1=b1, g1=g1, be1=be1, m1=m1, v1=v1,
                w2=w2, b2=b2, g2=g2, be2=be2, m2=m2, v2=v2)


# ---------------------------------------------------------------------------
# `up.forward(x1, x2)`  (inputs / output in NCHW, matching PyTorch)
# ---------------------------------------------------------------------------
def up_forward(x1_nchw, x2_nchw, params, out_ch, images_per_program=None):
    x1 = x1_nchw.astype(jnp.float32)
    x2 = x2_nchw.astype(jnp.float32)
    N, C1, H1, W1 = x1.shape
    H, W = 2 * H1, 2 * W1                      # x1 upsampled spatial size

    # Faithful to the PyTorch code: diffX is the H diff but pads W, and vice
    # versa (F.pad order is (W_left, W_right, H_top, H_bottom)).  Identity at
    # the shapes used here (diff == 0), so no extra HBM traffic.
    diffX = H - x2.shape[2]
    diffY = W - x2.shape[3]
    if diffX != 0 or diffY != 0:
        x2 = jnp.pad(x2, ((0, 0), (0, 0),
                          (diffY // 2, int(diffY / 2)),
                          (diffX // 2, int(diffX / 2))))
    assert x2.shape[2:] == (H, W), "padded skip connection must match x1"
    C2 = x2.shape[1]

    c1p = _round_up(C1, 8)
    c2p = _round_up(C2, 8)
    coutp = _round_up(out_ch, 8)

    # Free NCHW -> (N, C, H*W) reshapes + tiny channel zero-pad to 8 sublanes.
    x1r = x1.reshape(N, C1, H1 * W1)
    x2r = x2.reshape(N, C2, H * W)
    if c1p != C1:
        x1r = jnp.pad(x1r, ((0, 0), (0, c1p - C1), (0, 0)))
    if c2p != C2:
        x2r = jnp.pad(x2r, ((0, 0), (0, c2p - C2), (0, 0)))

    # conv1 is defined over cat([x2, x1], dim=1): split its weights along cin.
    (w1x2, w1x1), s1 = _fold_conv_bn(
        params["w1"], params["b1"], params["g1"], params["be1"],
        params["m1"], params["v1"],
        cin_splits=[(0, C2, c2p), (C2, C1, c1p)], cout_p=coutp)
    (w2,), s2 = _fold_conv_bn(
        params["w2"], params["b2"], params["g2"], params["be2"],
        params["m2"], params["v2"],
        cin_splits=[(0, out_ch, coutp)], cout_p=coutp)

    # Batch folding: default = whole batch in one program (no per-grid-step
    # overhead; best on single-TC v5e/v6e).  On v7x pass ceil(N/2) to keep
    # both TensorCores busy.
    B = N if images_per_program is None else images_per_program
    assert N % B == 0, "images_per_program must divide the batch"

    u_t = _upsample2x_matrix(H1, W1)           # (H1*W1, H*W)
    masks = _tap_masks(H, W, B)                # (8, 1, B*H*W)

    y = up_fused(x1r, x2r, u_t, masks, w1x2, w1x1, s1, w2, s2, H=H, W=W, B=B)
    return y[:, :out_ch, :].reshape(N, out_ch, H, W)


# ---------------------------------------------------------------------------
# Pure-JAX reference (lax conv + gather upsample) for correctness check
# ---------------------------------------------------------------------------
def _bilinear_up2_ref(x):   # (N, C, H, W)
    N, C, H, W = x.shape

    def coords(n_in, n_out):
        src = jnp.arange(n_out, dtype=jnp.float32) * (n_in - 1) / max(n_out - 1, 1)
        lo = jnp.clip(jnp.floor(src).astype(jnp.int32), 0, max(n_in - 2, 0))
        hi = jnp.minimum(lo + 1, n_in - 1)
        return src - lo.astype(jnp.float32), lo, hi

    fy, y0, y1 = coords(H, 2 * H)
    fx, x0, x1 = coords(W, 2 * W)
    rows = (jnp.take(x, y0, axis=2) * (1.0 - fy)[None, None, :, None]
            + jnp.take(x, y1, axis=2) * fy[None, None, :, None])
    return (jnp.take(rows, x0, axis=3) * (1.0 - fx)[None, None, None, :]
            + jnp.take(rows, x1, axis=3) * fx[None, None, None, :])


def _conv_bn_relu_ref(x, w, b, gamma, beta, mean, var):
    y = lax.conv_general_dilated(
        x, w, window_strides=(1, 1), padding="SAME",
        dimension_numbers=("NCHW", "HWIO", "NCHW"),
        precision=lax.Precision.HIGHEST)
    scale = gamma / jnp.sqrt(var + _EPS)
    y = (y + b.reshape(1, -1, 1, 1)) * scale.reshape(1, -1, 1, 1)
    y = y + (beta - mean * scale).reshape(1, -1, 1, 1)
    return jnp.maximum(y, 0.0)


def up_forward_ref(x1_nchw, x2_nchw, params, out_ch):
    x1 = x1_nchw.astype(jnp.float32)
    x2 = x2_nchw.astype(jnp.float32)
    x1 = _bilinear_up2_ref(x1)
    diffX = x1.shape[2] - x2.shape[2]
    diffY = x1.shape[3] - x2.shape[3]
    x2 = jnp.pad(x2, ((0, 0), (0, 0),
                      (diffY // 2, int(diffY / 2)),
                      (diffX // 2, int(diffX / 2))))
    x = jnp.concatenate([x2, x1], axis=1)
    y = _conv_bn_relu_ref(x, params["w1"], params["b1"], params["g1"],
                          params["be1"], params["m1"], params["v1"])
    y = _conv_bn_relu_ref(y, params["w2"], params["b2"], params["g2"],
                          params["be2"], params["m2"], params["v2"])
    return y


if __name__ == "__main__":
    # up(in_ch=8, out_ch=4, bilinear=True)
    N, in_ch, out_ch = 2, 8, 4
    H2, W2 = 16, 16            # x2 spatial
    H1, W1 = H2 // 2, W2 // 2  # x1 spatial (upsampled by 2 inside forward)

    key = jax.random.PRNGKey(0)
    kx1, kx2, kp = jax.random.split(key, 3)
    x1 = jax.random.normal(kx1, (N, in_ch // 2, H1, W1), jnp.float32)
    x2 = jax.random.normal(kx2, (N, in_ch // 2, H2, W2), jnp.float32)
    params = make_params(kp, in_ch, out_ch)

    fwd = jax.jit(functools.partial(up_forward, out_ch=out_ch))
    out = jax.block_until_ready(fwd(x1, x2, params))

    ref = jax.block_until_ready(up_forward_ref(x1, x2, params, out_ch))
    np.testing.assert_allclose(np.asarray(out), np.asarray(ref),
                               rtol=5e-4, atol=5e-4)
    assert out.shape == (N, out_ch, H2, W2)
    print("KERNEL_OK")
</pallas_src>

<mosaic_0001>
module attributes {stable_mosaic.version = 11 : i64} {
  func.func @_up_fused_kernel(%arg0: i32, %arg1: memref<2x8x64xf32, #tpu.memory_space<vmem>>, %arg2: memref<2x8x256xf32, #tpu.memory_space<vmem>>, %arg3: memref<64x256xf32, #tpu.memory_space<vmem>>, %arg4: memref<8x1x512xf32, #tpu.memory_space<vmem>>, %arg5: memref<8x72xf32, #tpu.memory_space<vmem>>, %arg6: memref<8x72xf32, #tpu.memory_space<vmem>>, %arg7: memref<8x1xf32, #tpu.memory_space<vmem>>, %arg8: memref<8x72xf32, #tpu.memory_space<vmem>>, %arg9: memref<8x1xf32, #tpu.memory_space<vmem>>, %arg10: memref<2x8x256xf32, #tpu.memory_space<vmem>>) attributes {dimension_semantics = [#tpu.dimension_semantics<parallel>], iteration_bounds = array<i64: 1>, scalar_prefetch = 0 : i64, scratch_operands = 0 : i64, tpu.core_type = #tpu.core_type<tc>, window_params = [{transform_indices = @transform_0, window_bounds = array<i64: 2, 8, 64>}, {transform_indices = @transform_1, window_bounds = array<i64: 2, 8, 256>}, {pipeline_mode = #tpu.pipeline_mode<synchronous>, transform_indices = @transform_2, window_bounds = array<i64: 64, 256>}, {pipeline_mode = #tpu.pipeline_mode<synchronous>, transform_indices = @transform_3, window_bounds = array<i64: 8, 1, 512>}, {pipeline_mode = #tpu.pipeline_mode<synchronous>, transform_indices = @transform_4, window_bounds = array<i64: 8, 72>}, {pipeline_mode = #tpu.pipeline_mode<synchronous>, transform_indices = @transform_5, window_bounds = array<i64: 8, 72>}, {pipeline_mode = #tpu.pipeline_mode<synchronous>, transform_indices = @transform_6, window_bounds = array<i64: 8, 1>}, {pipeline_mode = #tpu.pipeline_mode<synchronous>, transform_indices = @transform_7, window_bounds = array<i64: 8, 72>}, {pipeline_mode = #tpu.pipeline_mode<synchronous>, transform_indices = @transform_8, window_bounds = array<i64: 8, 1>}, {transform_indices = @transform_9, window_bounds = array<i64: 2, 8, 256>}]} {
    %c0 = arith.constant 0 : index
    %c0_0 = arith.constant 0 : index
    %c0_1 = arith.constant 0 : index
    %0 = vector.load %arg4[%c0, %c0_0, %c0_1] : memref<8x1x512xf32, #tpu.memory_space<vmem>>, vector<8x1x512xf32>
    %c0_2 = arith.constant 0 : index
    %c0_3 = arith.constant 0 : index
    %c0_4 = arith.constant 0 : index
    %1 = vector.load %arg1[%c0_2, %c0_3, %c0_4] : memref<2x8x64xf32, #tpu.memory_space<vmem>>, vector<1x8x64xf32>
    %2 = vector.shape_cast %1 : vector<1x8x64xf32> to vector<8x64xf32>
    %c0_5 = arith.constant 0 : index
    %c0_6 = arith.constant 0 : index
    %3 = vector.load %arg3[%c0_5, %c0_6] : memref<64x256xf32, #tpu.memory_space<vmem>>, vector<64x256xf32>
    %cst = arith.constant dense<0.000000e+00> : vector<8x256xf32>
    %4 = tpu.matmul %2, %3, %cst {dimension_numbers = #tpu.dot_dimension_numbers<[1], [0], [0], [1], [0, 0, 1, 1], [], []>} : vector<8x64xf32>, vector<64x256xf32>, vector<8x256xf32> -> vector<8x256xf32>
    %c1 = arith.constant 1 : index
    %c0_7 = arith.constant 0 : index
    %c0_8 = arith.constant 0 : index
    %5 = vector.load %arg1[%c1, %c0_7, %c0_8] : memref<2x8x64xf32, #tpu.memory_space<vmem>>, vector<1x8x64xf32>
    %6 = vector.shape_cast %5 : vector<1x8x64xf32> to vector<8x64xf32>
    %c0_9 = arith.constant 0 : index
    %c0_10 = arith.constant 0 : index
    %7 = vector.load %arg3[%c0_9, %c0_10] : memref<64x256xf32, #tpu.memory_space<vmem>>, vector<64x256xf32>
    %cst_11 = arith.constant dense<0.000000e+00> : vector<8x256xf32>
    %8 = tpu.matmul %6, %7, %cst_11 {dimension_numbers = #tpu.dot_dimension_numbers<[1], [0], [0], [1], [0, 0, 1, 1], [], []>} : vector<8x64xf32>, vector<64x256xf32>, vector<8x256xf32> -> vector<8x256xf32>
    %9 = tpu.concatenate %4, %8 in 1 : vector<8x256xf32>, vector<8x256xf32> -> vector<8x512xf32>
    %c0_12 = arith.constant 0 : index
    %c0_13 = arith.constant 0 : index
    %c0_14 = arith.constant 0 : index
    %10 = vector.load %arg2[%c0_12, %c0_13, %c0_14] : memref<2x8x256xf32, #tpu.memory_space<vmem>>, vector<1x8x256xf32>
    %11 = vector.shape_cast %10 : vector<1x8x256xf32> to vector<8x256xf32>
    %c1_15 = arith.constant 1 : index
    %c0_16 = arith.constant 0 : index
    %c0_17 = arith.constant 0 : index
    %12 = vector.load %arg2[%c1_15, %c0_16, %c0_17] : memref<2x8x256xf32, #tpu.memory_space<vmem>>, vector<1x8x256xf32>
    %13 = vector.shape_cast %12 : vector<1x8x256xf32> to vector<8x256xf32>
    %14 = tpu.concatenate %11, %13 in 1 : vector<8x256xf32>, vector<8x256xf32> -> vector<8x512xf32>
    %c0_18 = arith.constant 0 : index
    %c0_19 = arith.constant 0 : index
    %15 = vector.load %arg5[%c0_18, %c0_19] : memref<8x72xf32, #tpu.memory_space<vmem>>, vector<8x72xf32>
    %c17_i32 = arith.constant 17 : i32
    %16 = tpu.dynamic_rotate %14 by %c17_i32 dim 1 : vector<8x512xf32>, i32 -> vector<8x512xf32>
    %17 = vector.extract_strided_slice %0 {offsets = [0, 0, 0], sizes = [1, 1, 512], strides = [1, 1, 1]} : vector<8x1x512xf32> to vector<1x1x512xf32>
    %18 = vector.shape_cast %17 : vector<1x1x512xf32> to vector<1x512xf32>
    %19 = vector.broadcast %18 : vector<1x512xf32> to vector<8x512xf32>
    %20 = arith.mulf %16, %19 : vector<8x512xf32>
    %c16_i32 = arith.constant 16 : i32
    %21 = tpu.dynamic_rotate %14 by %c16_i32 dim 1 : vector<8x512xf32>, i32 -> vector<8x512xf32>
    %22 = vector.extract_strided_slice %0 {offsets = [1, 0, 0], sizes = [1, 1, 512], strides = [1, 1, 1]} : vector<8x1x512xf32> to vector<1x1x512xf32>
    %23 = vector.shape_cast %22 : vector<1x1x512xf32> to vector<1x512xf32>
    %24 = vector.broadcast %23 : vector<1x512xf32> to vector<8x512xf32>
    %25 = arith.mulf %21, %24 : vector<8x512xf32>
    %c15_i32 = arith.constant 15 : i32
    %26 = tpu.dynamic_rotate %14 by %c15_i32 dim 1 : vector<8x512xf32>, i32 -> vector<8x512xf32>
    %27 = vector.extract_strided_slice %0 {offsets = [2, 0, 0], sizes = [1, 1, 512], strides = [1, 1, 1]} : vector<8x1x512xf32> to vector<1x1x512xf32>
    %28 = vector.shape_cast %27 : vector<1x1x512xf32> to vector<1x512xf32>
    %29 = vector.broadcast %28 : vector<1x512xf32> to vector<8x512xf32>
    %30 = arith.mulf %26, %29 : vector<8x512xf32>
    %c1_i32 = arith.constant 1 : i32
    %31 = tpu.dynamic_rotate %14 by %c1_i32 dim 1 : vector<8x512xf32>, i32 -> vector<8x512xf32>
    %32 = vector.extract_strided_slice %0 {offsets = [3, 0, 0], sizes = [1, 1, 512], strides = [1, 1, 1]} : vector<8x1x512xf32> to vector<1x1x512xf32>
    %33 = vector.shape_cast %32 : vector<1x1x512xf32> to vector<1x512xf32>
    %34 = vector.broadcast %33 : vector<1x512xf32> to vector<8x512xf32>
    %35 = arith.mulf %31, %34 : vector<8x512xf32>
    %c511_i32 = arith.constant 511 : i32
    %36 = tpu.dynamic_rotate %14 by %c511_i32 dim 1 : vector<8x512xf32>, i32 -> vector<8x512xf32>
    %37 = vector.extract_strided_slice %0 {offsets = [4, 0, 0], sizes = [1, 1, 512], strides = [1, 1, 1]} : vector<8x1x512xf32> to vector<1x1x512xf32>
    %38 = vector.shape_cast %37 : vector<1x1x512xf32> to vector<1x512xf32>
    %39 = vector.broadcast %38 : vector<1x512xf32> to vector<8x512xf32>
    %40 = arith.mulf %36, %39 : vector<8x512xf32>
    %c497_i32 = arith.constant 497 : i32
    %41 = tpu.dynamic_rotate %14 by %c497_i32 dim 1 : vector<8x512xf32>, i32 -> vector<8x512xf32>
    %42 = vector.extract_strided_slice %0 {offsets = [5, 0, 0], sizes = [1, 1, 512], strides = [1, 1, 1]} : vector<8x1x512xf32> to vector<1x1x512xf32>
    %43 = vector.shape_cast %42 : vector<1x1x512xf32> to vector<1x512xf32>
    %44 = vector.broadcast %43 : vector<1x512xf32> to vector<8x512xf32>
    %45 = arith.mulf %41, %44 : vector<8x512xf32>
    %c496_i32 = arith.constant 496 : i32
    %46 = tpu.dynamic_rotate %14 by %c496_i32 dim 1 : vector<8x512xf32>, i32 -> vector<8x512xf32>
    %47 = vector.extract_strided_slice %0 {offsets = [6, 0, 0], sizes = [1, 1, 512], strides = [1, 1, 1]} : vector<8x1x512xf32> to vector<1x1x512xf32>
    %48 = vector.shape_cast %47 : vector<1x1x512xf32> to vector<1x512xf32>
    %49 = vector.broadcast %48 : vector<1x512xf32> to vector<8x512xf32>
    %50 = arith.mulf %46, %49 : vector<8x512xf32>
    %c495_i32 = arith.constant 495 : i32
    %51 = tpu.dynamic_rotate %14 by %c495_i32 dim 1 : vector<8x512xf32>, i32 -> vector<8x512xf32>
    %52 = vector.extract_strided_slice %0 {offsets = [7, 0, 0], sizes = [1, 1, 512], strides = [1, 1, 1]} : vector<8x1x512xf32> to vector<1x1x512xf32>
    %53 = vector.shape_cast %52 : vector<1x1x512xf32> to vector<1x512xf32>
    %54 = vector.broadcast %53 : vector<1x512xf32> to vector<8x512xf32>
    %55 = arith.mulf %51, %54 : vector<8x512xf32>
    %56 = tpu.concatenate %20, %25, %30, %35, %14, %40, %45, %50, %55 in 0 : vector<8x512xf32>, vector<8x512xf32>, vector<8x512xf32>, vector<8x512xf32>, vector<8x512xf32>, vector<8x512xf32>, vector<8x512xf32>, vector<8x512xf32>, vector<8x512xf32> -> vector<72x512xf32>
    %cst_20 = arith.constant dense<0.000000e+00> : vector<8x512xf32>
    %57 = tpu.matmul %15, %56, %cst_20 {dimension_numbers = #tpu.dot_dimension_numbers<[1], [0], [0], [1], [0, 0, 1, 1], [], []>} : vector<8x72xf32>, vector<72x512xf32>, vector<8x512xf32> -> vector<8x512xf32>
    %c0_21 = arith.constant 0 : index
    %c0_22 = arith.constant 0 : index
    %58 = vector.load %arg6[%c0_21, %c0_22] : memref<8x72xf32, #tpu.memory_space<vmem>>, vector<8x72xf32>
    %c17_i32_23 = arith.constant 17 : i32
    %59 = tpu.dynamic_rotate %9 by %c17_i32_23 dim 1 : vector<8x512xf32>, i32 -> vector<8x512xf32>
    %60 = vector.extract_strided_slice %0 {offsets = [0, 0, 0], sizes = [1, 1, 512], strides = [1, 1, 1]} : vector<8x1x512xf32> to vector<1x1x512xf32>
    %61 = vector.shape_cast %60 : vector<1x1x512xf32> to vector<1x512xf32>
    %62 = vector.broadcast %61 : vector<1x512xf32> to vector<8x512xf32>
    %63 = arith.mulf %59, %62 : vector<8x512xf32>
    %c16_i32_24 = arith.constant 16 : i32
    %64 = tpu.dynamic_rotate %9 by %c16_i32_24 dim 1 : vector<8x512xf32>, i32 -> vector<8x512xf32>
    %65 = vector.extract_strided_slice %0 {offsets = [1, 0, 0], sizes = [1, 1, 512], strides = [1, 1, 1]} : vector<8x1x512xf32> to vector<1x1x512xf32>
    %66 = vector.shape_cast %65 : vector<1x1x512xf32> to vector<1x512xf32>
    %67 = vector.broadcast %66 : vector<1x512xf32> to vector<8x512xf32>
    %68 = arith.mulf %64, %67 : vector<8x512xf32>
    %c15_i32_25 = arith.constant 15 : i32
    %69 = tpu.dynamic_rotate %9 by %c15_i32_25 dim 1 : vector<8x512xf32>, i32 -> vector<8x512xf32>
    %70 = vector.extract_strided_slice %0 {offsets = [2, 0, 0], sizes = [1, 1, 512], strides = [1, 1, 1]} : vector<8x1x512xf32> to vector<1x1x512xf32>
    %71 = vector.shape_cast %70 : vector<1x1x512xf32> to vector<1x512xf32>
    %72 = vector.broadcast %71 : vector<1x512xf32> to vector<8x512xf32>
    %73 = arith.mulf %69, %72 : vector<8x512xf32>
    %c1_i32_26 = arith.constant 1 : i32
    %74 = tpu.dynamic_rotate %9 by %c1_i32_26 dim 1 : vector<8x512xf32>, i32 -> vector<8x512xf32>
    %75 = vector.extract_strided_slice %0 {offsets = [3, 0, 0], sizes = [1, 1, 512], strides = [1, 1, 1]} : vector<8x1x512xf32> to vector<1x1x512xf32>
    %76 = vector.shape_cast %75 : vector<1x1x512xf32> to vector<1x512xf32>
    %77 = vector.broadcast %76 : vector<1x512xf32> to vector<8x512xf32>
    %78 = arith.mulf %74, %77 : vector<8x512xf32>
    %c511_i32_27 = arith.constant 511 : i32
    %79 = tpu.dynamic_rotate %9 by %c511_i32_27 dim 1 : vector<8x512xf32>, i32 -> vector<8x512xf32>
    %80 = vector.extract_strided_slice %0 {offsets = [4, 0, 0], sizes = [1, 1, 512], strides = [1, 1, 1]} : vector<8x1x512xf32> to vector<1x1x512xf32>
    %81 = vector.shape_cast %80 : vector<1x1x512xf32> to vector<1x512xf32>
    %82 = vector.broadcast %81 : vector<1x512xf32> to vector<8x512xf32>
    %83 = arith.mulf %79, %82 : vector<8x512xf32>
    %c497_i32_28 = arith.constant 497 : i32
    %84 = tpu.dynamic_rotate %9 by %c497_i32_28 dim 1 : vector<8x512xf32>, i32 -> vector<8x512xf32>
    %85 = vector.extract_strided_slice %0 {offsets = [5, 0, 0], sizes = [1, 1, 512], strides = [1, 1, 1]} : vector<8x1x512xf32> to vector<1x1x512xf32>
    %86 = vector.shape_cast %85 : vector<1x1x512xf32> to vector<1x512xf32>
    %87 = vector.broadcast %86 : vector<1x512xf32> to vector<8x512xf32>
    %88 = arith.mulf %84, %87 : vector<8x512xf32>
    %c496_i32_29 = arith.constant 496 : i32
    %89 = tpu.dynamic_rotate %9 by %c496_i32_29 dim 1 : vector<8x512xf32>, i32 -> vector<8x512xf32>
    %90 = vector.extract_strided_slice %0 {offsets = [6, 0, 0], sizes = [1, 1, 512], strides = [1, 1, 1]} : vector<8x1x512xf32> to vector<1x1x512xf32>
    %91 = vector.shape_cast %90 : vector<1x1x512xf32> to vector<1x512xf32>
    %92 = vector.broadcast %91 : vector<1x512xf32> to vector<8x512xf32>
    %93 = arith.mulf %89, %92 : vector<8x512xf32>
    %c495_i32_30 = arith.constant 495 : i32
    %94 = tpu.dynamic_rotate %9 by %c495_i32_30 dim 1 : vector<8x512xf32>, i32 -> vector<8x512xf32>
    %95 = vector.extract_strided_slice %0 {offsets = [7, 0, 0], sizes = [1, 1, 512], strides = [1, 1, 1]} : vector<8x1x512xf32> to vector<1x1x512xf32>
    %96 = vector.shape_cast %95 : vector<1x1x512xf32> to vector<1x512xf32>
    %97 = vector.broadcast %96 : vector<1x512xf32> to vector<8x512xf32>
    %98 = arith.mulf %94, %97 : vector<8x512xf32>
    %99 = tpu.concatenate %63, %68, %73, %78, %9, %83, %88, %93, %98 in 0 : vector<8x512xf32>, vector<8x512xf32>, vector<8x512xf32>, vector<8x512xf32>, vector<8x512xf32>, vector<8x512xf32>, vector<8x512xf32>, vector<8x512xf32>, vector<8x512xf32> -> vector<72x512xf32>
    %cst_31 = arith.constant dense<0.000000e+00> : vector<8x512xf32>
    %100 = tpu.matmul %58, %99, %cst_31 {dimension_numbers = #tpu.dot_dimension_numbers<[1], [0], [0], [1], [0, 0, 1, 1], [], []>} : vector<8x72xf32>, vector<72x512xf32>, vector<8x512xf32> -> vector<8x512xf32>
    %101 = arith.addf %57, %100 : vector<8x512xf32>
    %c0_32 = arith.constant 0 : index
    %c0_33 = arith.constant 0 : index
    %102 = vector.load %arg7[%c0_32, %c0_33] : memref<8x1xf32, #tpu.memory_space<vmem>>, vector<8x1xf32>
    %103 = vector.broadcast %102 : vector<8x1xf32> to vector<8x512xf32>
    %104 = arith.addf %101, %103 : vector<8x512xf32>
    %cst_34 = arith.constant 0.000000e+00 : f32
    %105 = vector.broadcast %cst_34 : f32 to vector<8x512xf32>
    %106 = arith.maximumf %104, %105 : vector<8x512xf32>
    %c0_35 = arith.constant 0 : index
    %c0_36 = arith.constant 0 : index
    %107 = vector.load %arg8[%c0_35, %c0_36] : memref<8x72xf32, #tpu.memory_space<vmem>>, vector<8x72xf32>
    %c17_i32_37 = arith.constant 17 : i32
    %108 = tpu.dynamic_rotate %106 by %c17_i32_37 dim 1 : vector<8x512xf32>, i32 -> vector<8x512xf32>
    %109 = vector.extract_strided_slice %0 {offsets = [0, 0, 0], sizes = [1, 1, 512], strides = [1, 1, 1]} : vector<8x1x512xf32> to vector<1x1x512xf32>
    %110 = vector.shape_cast %109 : vector<1x1x512xf32> to vector<1x512xf32>
    %111 = vector.broadcast %110 : vector<1x512xf32> to vector<8x512xf32>
    %112 = arith.mulf %108, %111 : vector<8x512xf32>
    %c16_i32_38 = arith.constant 16 : i32
    %113 = tpu.dynamic_rotate %106 by %c16_i32_38 dim 1 : vector<8x512xf32>, i32 -> vector<8x512xf32>
    %114 = vector.extract_strided_slice %0 {offsets = [1, 0, 0], sizes = [1, 1, 512], strides = [1, 1, 1]} : vector<8x1x512xf32> to vector<1x1x512xf32>
    %115 = vector.shape_cast %114 : vector<1x1x512xf32> to vector<1x512xf32>
    %116 = vector.broadcast %115 : vector<1x512xf32> to vector<8x512xf32>
    %117 = arith.mulf %113, %116 : vector<8x512xf32>
    %c15_i32_39 = arith.constant 15 : i32
    %118 = tpu.dynamic_rotate %106 by %c15_i32_39 dim 1 : vector<8x512xf32>, i32 -> vector<8x512xf32>
    %119 = vector.extract_strided_slice %0 {offsets = [2, 0, 0], sizes = [1, 1, 512], strides = [1, 1, 1]} : vector<8x1x512xf32> to vector<1x1x512xf32>
    %120 = vector.shape_cast %119 : vector<1x1x512xf32> to vector<1x512xf32>
    %121 = vector.broadcast %120 : vector<1x512xf32> to vector<8x512xf32>
    %122 = arith.mulf %118, %121 : vector<8x512xf32>
    %c1_i32_40 = arith.constant 1 : i32
    %123 = tpu.dynamic_rotate %106 by %c1_i32_40 dim 1 : vector<8x512xf32>, i32 -> vector<8x512xf32>
    %124 = vector.extract_strided_slice %0 {offsets = [3, 0, 0], sizes = [1, 1, 512], strides = [1, 1, 1]} : vector<8x1x512xf32> to vector<1x1x512xf32>
    %125 = vector.shape_cast %124 : vector<1x1x512xf32> to vector<1x512xf32>
    %126 = vector.broadcast %125 : vector<1x512xf32> to vector<8x512xf32>
    %127 = arith.mulf %123, %126 : vector<8x512xf32>
    %c511_i32_41 = arith.constant 511 : i32
    %128 = tpu.dynamic_rotate %106 by %c511_i32_41 dim 1 : vector<8x512xf32>, i32 -> vector<8x512xf32>
    %129 = vector.extract_strided_slice %0 {offsets = [4, 0, 0], sizes = [1, 1, 512], strides = [1, 1, 1]} : vector<8x1x512xf32> to vector<1x1x512xf32>
    %130 = vector.shape_cast %129 : vector<1x1x512xf32> to vector<1x512xf32>
    %131 = vector.broadcast %130 : vector<1x512xf32> to vector<8x512xf32>
    %132 = arith.mulf %128, %131 : vector<8x512xf32>
    %c497_i32_42 = arith.constant 497 : i32
    %133 = tpu.dynamic_rotate %106 by %c497_i32_42 dim 1 : vector<8x512xf32>, i32 -> vector<8x512xf32>
    %134 = vector.extract_strided_slice %0 {offsets = [5, 0, 0], sizes = [1, 1, 512], strides = [1, 1, 1]} : vector<8x1x512xf32> to vector<1x1x512xf32>
    %135 = vector.shape_cast %134 : vector<1x1x512xf32> to vector<1x512xf32>
    %136 = vector.broadcast %135 : vector<1x512xf32> to vector<8x512xf32>
    %137 = arith.mulf %133, %136 : vector<8x512xf32>
    %c496_i32_43 = arith.constant 496 : i32
    %138 = tpu.dynamic_rotate %106 by %c496_i32_43 dim 1 : vector<8x512xf32>, i32 -> vector<8x512xf32>
    %139 = vector.extract_strided_slice %0 {offsets = [6, 0, 0], sizes = [1, 1, 512], strides = [1, 1, 1]} : vector<8x1x512xf32> to vector<1x1x512xf32>
    %140 = vector.shape_cast %139 : vector<1x1x512xf32> to vector<1x512xf32>
    %141 = vector.broadcast %140 : vector<1x512xf32> to vector<8x512xf32>
    %142 = arith.mulf %138, %141 : vector<8x512xf32>
    %c495_i32_44 = arith.constant 495 : i32
    %143 = tpu.dynamic_rotate %106 by %c495_i32_44 dim 1 : vector<8x512xf32>, i32 -> vector<8x512xf32>
    %144 = vector.extract_strided_slice %0 {offsets = [7, 0, 0], sizes = [1, 1, 512], strides = [1, 1, 1]} : vector<8x1x512xf32> to vector<1x1x512xf32>
    %145 = vector.shape_cast %144 : vector<1x1x512xf32> to vector<1x512xf32>
    %146 = vector.broadcast %145 : vector<1x512xf32> to vector<8x512xf32>
    %147 = arith.mulf %143, %146 : vector<8x512xf32>
    %148 = tpu.concatenate %112, %117, %122, %127, %106, %132, %137, %142, %147 in 0 : vector<8x512xf32>, vector<8x512xf32>, vector<8x512xf32>, vector<8x512xf32>, vector<8x512xf32>, vector<8x512xf32>, vector<8x512xf32>, vector<8x512xf32>, vector<8x512xf32> -> vector<72x512xf32>
    %cst_45 = arith.constant dense<0.000000e+00> : vector<8x512xf32>
    %149 = tpu.matmul %107, %148, %cst_45 {dimension_numbers = #tpu.dot_dimension_numbers<[1], [0], [0], [1], [0, 0, 1, 1], [], []>} : vector<8x72xf32>, vector<72x512xf32>, vector<8x512xf32> -> vector<8x512xf32>
    %c0_46 = arith.constant 0 : index
    %c0_47 = arith.constant 0 : index
    %150 = vector.load %arg9[%c0_46, %c0_47] : memref<8x1xf32, #tpu.memory_space<vmem>>, vector<8x1xf32>
    %151 = vector.broadcast %150 : vector<8x1xf32> to vector<8x512xf32>
    %152 = arith.addf %149, %151 : vector<8x512xf32>
    %cst_48 = arith.constant 0.000000e+00 : f32
    %153 = vector.broadcast %cst_48 : f32 to vector<8x512xf32>
    %154 = arith.maximumf %152, %153 : vector<8x512xf32>
    %155 = vector.extract_strided_slice %154 {offsets = [0, 0], sizes = [8, 256], strides = [1, 1]} : vector<8x512xf32> to vector<8x256xf32>
    %c0_49 = arith.constant 0 : index
    %c0_50 = arith.constant 0 : index
    %c0_51 = arith.constant 0 : index
    %156 = vector.load %arg10[%c0_49, %c0_50, %c0_51] : memref<2x8x256xf32, #tpu.memory_space<vmem>>, vector<1x8x256xf32>
    %157 = vector.shape_cast %156 : vector<1x8x256xf32> to vector<8x256xf32>
    %158 = vector.shape_cast %155 : vector<8x256xf32> to vector<1x8x256xf32>
    tpu.vector_store %arg10[%c0_49, %c0_50, %c0_51], %158 {strides = array<i32>} : memref<2x8x256xf32, #tpu.memory_space<vmem>>, vector<1x8x256xf32>,
    %159 = vector.extract_strided_slice %154 {offsets = [0, 256], sizes = [8, 256], strides = [1, 1]} : vector<8x512xf32> to vector<8x256xf32>
    %c1_52 = arith.constant 1 : index
    %c0_53 = arith.constant 0 : index
    %c0_54 = arith.constant 0 : index
    %160 = vector.load %arg10[%c1_52, %c0_53, %c0_54] : memref<2x8x256xf32, #tpu.memory_space<vmem>>, vector<1x8x256xf32>
    %161 = vector.shape_cast %160 : vector<1x8x256xf32> to vector<8x256xf32>
    %162 = vector.shape_cast %159 : vector<8x256xf32> to vector<1x8x256xf32>
    tpu.vector_store %arg10[%c1_52, %c0_53, %c0_54], %162 {strides = array<i32>} : memref<2x8x256xf32, #tpu.memory_space<vmem>>, vector<1x8x256xf32>,
    return
  }
  func.func @transform_0(%arg0: i32) -> (i32, i32, i32) {
    %c0_i32 = arith.constant 0 : i32
    %c0_i32_0 = arith.constant 0 : i32
    %c0_i32_1 = arith.constant 0 : i32
    return %arg0, %c0_i32, %c0_i32_0 : i32, i32, i32
  }
  func.func @transform_1(%arg0: i32) -> (i32, i32, i32) {
    %c0_i32 = arith.constant 0 : i32
    %c0_i32_0 = arith.constant 0 : i32
    %c0_i32_1 = arith.constant 0 : i32
    return %arg0, %c0_i32, %c0_i32_0 : i32, i32, i32
  }
  func.func @transform_2(%arg0: i32) -> (i32, i32) {
    %c0_i32 = arith.constant 0 : i32
    %c0_i32_0 = arith.constant 0 : i32
    %c0_i32_1 = arith.constant 0 : i32
    return %c0_i32, %c0_i32_0 : i32, i32
  }
  func.func @transform_3(%arg0: i32) -> (i32, i32, i32) {
    %c0_i32 = arith.constant 0 : i32
    %c0_i32_0 = arith.constant 0 : i32
    %c0_i32_1 = arith.constant 0 : i32
    %c0_i32_2 = arith.constant 0 : i32
    return %c0_i32, %c0_i32_0, %c0_i32_1 : i32, i32, i32
  }
  func.func @transform_4(%arg0: i32) -> (i32, i32) {
    %c0_i32 = arith.constant 0 : i32
    %c0_i32_0 = arith.constant 0 : i32
    %c0_i32_1 = arith.constant 0 : i32
    return %c0_i32, %c0_i32_0 : i32, i32
  }
  func.func @transform_5(%arg0: i32) -> (i32, i32) {
    %c0_i32 = arith.constant 0 : i32
    %c0_i32_0 = arith.constant 0 : i32
    %c0_i32_1 = arith.constant 0 : i32
    return %c0_i32, %c0_i32_0 : i32, i32
  }
  func.func @transform_6(%arg0: i32) -> (i32, i32) {
    %c0_i32 = arith.constant 0 : i32
    %c0_i32_0 = arith.constant 0 : i32
    %c0_i32_1 = arith.constant 0 : i32
    return %c0_i32, %c0_i32_0 : i32, i32
  }
  func.func @transform_7(%arg0: i32) -> (i32, i32) {
    %c0_i32 = arith.constant 0 : i32
    %c0_i32_0 = arith.constant 0 : i32
    %c0_i32_1 = arith.constant 0 : i32
    return %c0_i32, %c0_i32_0 : i32, i32
  }
  func.func @transform_8(%arg0: i32) -> (i32, i32) {
    %c0_i32 = arith.constant 0 : i32
    %c0_i32_0 = arith.constant 0 : i32
    %c0_i32_1 = arith.constant 0 : i32
    return %c0_i32, %c0_i32_0 : i32, i32
  }
  func.func @transform_9(%arg0: i32) -> (i32, i32, i32) {
    %c0_i32 = arith.constant 0 : i32
    %c0_i32_0 = arith.constant 0 : i32
    %c0_i32_1 = arith.constant 0 : i32
    return %arg0, %c0_i32, %c0_i32_0 : i32, i32, i32
  }
}

</mosaic_0001>

<bundles_post_ra>
// kernel: up_forward.1
= control target key start
LH: loop header
LB: loop body
LE: loop exit
PB: predicated region body
PF: predicated region fallthrough
CT: control target
= control target key end

     0   :  { %v2402_v3 = vmov 0.0   ;;  %s1404_s20 = smov 17   ;;  %vm57_vm0 = vcmask 523264   ;;  %s1406_s11 = smov 15   ;;  %v222_v33 = vlaneseq  ;;  %vm649_vm9 = vcmask 588800   ;;  %s2392_s2 = inlined_call_operand.vmem [shape: f32[64,256], index: 2, kind: input, shape index: {}]   ;;  %s2393_s1 = inlined_call_operand.vmem [shape: f32[2,8,256], index: 1, kind: input, shape index: {}]   ;;  %s2394_s0 = inlined_call_operand.vmem [shape: f32[2,8,64], index: 0, kind: input, shape index: {}]   ;;  %s2395_s3 = inlined_call_operand.vmem [shape: f32[8,1,512], index: 3, kind: input, shape index: {}]   ;;  %s2396_s6 = inlined_call_operand.vmem [shape: f32[8,1], index: 6, kind: input, shape index: {}]   ;;  %s2397_s5 = inlined_call_operand.vmem [shape: f32[8,72], index: 5, kind: input, shape index: {}]   ;;  %s2398_s4 = inlined_call_operand.vmem [shape: f32[8,72], index: 4, kind: input, shape index: {}]   ;;  %s2399_s8 = inlined_call_operand.vmem [shape: f32[8,1], index: 8, kind: input, shape index: {}]   ;;  %s2400_s7 = inlined_call_operand.vmem [shape: f32[8,72], index: 7, kind: input, shape index: {}]   ;;  %s2401_s9 = inlined_call_operand.vmem [shape: f32[2,8,256], index: 9, kind: output, shape index: {}]  }
   0x1   :  { %v42_v0 = vld [vmem:[%s2392_s2 + $0x8] sm:$0xff]  ;;  %v44_v1 = vld [vmem:[%s2392_s2 + $0x18] sm:$0xff]  ;;  %v41_v2 = vld [vmem:[%s2392_s2] sm:$0xff]  ;;  %125 = vmatprep.mubr.f32.mxu0 %v2402_v3  ;;  %201 = vmatprep.mubr.f32.mxu1 %v2402_v3  ;;  %s1408_s16 = smov 127   ;;  %s1409_s17 = smov 113  }
   0x2   :  { %v1260_v4 = vpack.c.bf16 %v44_v1, %v42_v0  ;;  %v43_v5 = vld [vmem:[%s2392_s2 + $0x10] sm:$0xff]  ;;  %v46_v6 = vld [vmem:[%s2392_s2 + $0x28] sm:$0xff]  ;;  %v48_v7 = vld [vmem:[%s2392_s2 + $0x38] sm:$0xff]  ;;  %v1569_v35 = vand.u32 127, %v222_v33  ;;  %v231_v36 = vshrl.u32 %v222_v33, 7  ;;  %s1410_s18 = smov 112  }
   0x3   :  { %v1262_v8 = vpack.c.bf16 %v43_v5, %v41_v2  ;;  %v1264_v9 = vpack.c.bf16 %v48_v7, %v46_v6  ;;  %v45_v10 = vld [vmem:[%s2392_s2 + $0x20] sm:$0xff]  ;;  %v47_v11 = vld [vmem:[%s2392_s2 + $0x30] sm:$0xff]  ;;  %v50_v12 = vld [vmem:[%s2392_s2 + $0x48] sm:$0xff]  ;;  %s1411_s19 = smov 111  }
   0x4   :  { %1261 = vmatprep.subr.bf16.mxu0 %v1260_v4  ;;  %1277 = vmatprep.subr.bf16.mxu1 %v1260_v4  ;;  %v52_v13 = vld [vmem:[%s2392_s2 + $0x58] sm:$0xff]  ;;  %v1266_v14 = vpack.c.bf16 %v47_v11, %v45_v10  ;;  %v49_v16 = vld [vmem:[%s2392_s2 + $0x40] sm:$0xff]  ;;  %v51_v17 = vld [vmem:[%s2392_s2 + $0x50] sm:$0xff]  ;;  %vm224_vm1 = vcmp.lt.s32.totalorder %v1569_v35, 17  ;;  %v1575_v38 = vsub.s32 0, %v231_v36  ;;  %v1577_v39 = vsub.s32 1, %v231_v36 }
   0x5   :  { %1263 = vmatpush1.bf16.msra.mxu0 %v1262_v8  ;;  %1279 = vmatpush1.bf16.msra.mxu1 %v1262_v8  ;;  %v1268_v15 = vpack.c.bf16 %v52_v13, %v50_v12  ;;  %v54_v18 = vld [vmem:[%s2392_s2 + $0x68] sm:$0xff]  ;;  %v56_v19 = vld [vmem:[%s2392_s2 + $0x78] sm:$0xff]  ;;  %v1515_v21 = vld [vmem:[%s2393_s1] sm:$0xff]  ;;  %v1270_v22 = vpack.c.bf16 %v51_v17, %v49_v16  ;;  %v1579_v41 = vsub.s32 2, %v231_v36  ;;  %v1595_v49 = vsub.s32 3, %v231_v36 }
   0x6   :  { %1265 = vmatprep.subr.bf16.mxu0 %v1264_v9  ;;  %1281 = vmatprep.subr.bf16.mxu1 %v1264_v9  ;;  %v1510_v20 = vld [vmem:[%s2393_s1 + $0x8] sm:$0xff]  ;;  %2440 = vst [vmem:[#allocation3_spill] sm:$0xff] %v1515_v21  ;;  %v1524_v23 = vld [vmem:[%s2393_s1 + $0x18] sm:$0xff]  ;;  %v1529_v24 = vld [vmem:[%s2393_s1 + $0x10] sm:$0xff]  ;;  %v1272_v25 = vpack.c.bf16 %v56_v19, %v54_v18  ;;  %s1405_s1 = smov 16   ;;  %vm262_vm2 = vcmp.lt.s32.totalorder %v1569_v35, 16 }
   0x7   :  { %2439 = vst [vmem:[#allocation2_spill] sm:$0xff] %v1510_v20  ;;  %216 = vrot.lane.b32.xlu1 %v1510_v20, %s1404_s20  ;;  %214 = vrot.lane.b32.xlu0 %v1515_v21, %s1404_s20  ;;  %2441 = vst [vmem:[#allocation4_spill] sm:$0xff] %v1524_v23  ;;  %v53_v26 = vld [vmem:[%s2392_s2 + $0x60] sm:$0xff]  ;;  %v55_v27 = vld [vmem:[%s2392_s2 + $0x70] sm:$0xff]  ;;  %vm300_vm3 = vcmp.lt.s32.totalorder %v1569_v35, 15  ;;  %vm338_vm4 = vcmp.lt.s32.totalorder %v1569_v35, 1 }
   0x8   :  { %2442 = vst [vmem:[#allocation5_spill] sm:$0xff] %v1529_v24  ;;  %v1274_v28 = vpack.c.bf16 %v55_v27, %v53_v26  ;;  %v40_v29 = vld [vmem:[%s2394_s0] sm:$0xff]  ;;  %v1248_v30 = vld [vmem:[%s2394_s0 + $0x8] sm:$0xff]  ;;  %s1407_s0 = smov 1   ;;  %2443 = vst [vmem:[#allocation6_spill] sm:$0xff] %v1575_v38  ;;  %vm376_vm5 = vcmp.lt.s32.totalorder %v1569_v35, 127 }
   0x9   :  { %1267 = vmatpush1.bf16.msra.mxu0 %v1266_v14  ;;  %1283 = vmatpush1.bf16.msra.mxu1 %v1266_v14  ;;  %v32_v37 = vld [vmem:[%s2395_s3] sm:$0xf]  ;;  %2444 = vst [vmem:[#allocation7_spill] sm:$0xff] %v1577_v39  ;;  %2446 = vst [vmem:[#allocation9_spill] sm:$0xff] %v1595_v49  ;;  %v33_v52 = vld [vmem:[%s2395_s3 + $0x4] sm:$0xf] }
   0xa   :  { %1269 = vmatprep.subr.bf16.mxu0 %v1268_v15  ;;  %1285 = vmatprep.subr.bf16.mxu1 %v1268_v15  ;;  %v1588_v46 = vrot.slane %v32_v37, %v1575_v38  ;;  %v1593_v48 = vrot.slane %v32_v37, %v1577_v39  ;;  %v1598_v50 = vrot.slane %v32_v37, %v1579_v41  ;;  %v34_v33 = vld [vmem:[%s2395_s3 + $0x8] sm:$0xf]  ;;  %vm452_vm6 = vcmp.lt.s32.totalorder %v1569_v35, 112 }
   0xb   :  { %220 = vrot.lane.b32.xlu1 %v1524_v23, %s1404_s20  ;;  %218 = vrot.lane.b32.xlu0 %v1529_v24, %s1404_s20  ;;  %v1608_v55 = vrot.slane %v33_v52, %v1575_v38  ;;  %v1611_v56 = vrot.slane %v33_v52, %v1577_v39  ;;  %v1621_v60 = vrot.slane %v32_v37, %v1595_v49  ;;  %v35_v37 = vld [vmem:[%s2395_s3 + $0xc] sm:$0xf]  ;;  %vm414_vm7 = vcmp.lt.s32.totalorder %v1569_v35, 113 }
   0xc   :  { %2445 = vst [vmem:[#allocation8_spill] sm:$0xff] %v1588_v46  ;;  %v1633_v0 = vrot.slane %v33_v52, %v1579_v41  ;;  %v1636_v1 = vrot.slane %v33_v52, %v1595_v49  ;;  %vm490_vm8 = vcmp.lt.s32.totalorder %v1569_v35, 111 }
   0xd   :  { %1271 = vmatpush1.bf16.msra.mxu0 %v1270_v22  ;;  %1287 = vmatpush1.bf16.msra.mxu1 %v1270_v22  ;;  %2448 = vst [vmem:[#allocation11_spill] sm:$0xff] %v1608_v55  ;;  %2449 = vst [vmem:[#allocation12_spill] sm:$0xff] %v1611_v56 }
   0xe   :  { %1273 = vmatprep.subr.bf16.mxu0 %v1272_v25  ;;  %1289 = vmatprep.subr.bf16.mxu1 %v1272_v25  ;;  %2451 = vst [vmem:[#allocation14_spill] sm:$0xff] %v1621_v60  ;;  %2455 = vst [vmem:[#allocation18_spill] sm:$0xff] %v1633_v0 }
   0xf   :  { %256 = vrot.lane.b32.xlu1 %v1510_v20, %s1405_s1  ;;  %254 = vrot.lane.b32.xlu0 %v1515_v21, %s1405_s1  ;;  %2456 = vst [vmem:[#allocation19_spill] sm:$0xff] %v1636_v1 }
  0x11   :  { %1275 = vmatpush1.bf16.msra.mxu0 %v1274_v28  ;;  %1291 = vmatpush1.bf16.msra.mxu1 %v1274_v28 }
  0x13   :  { %260 = vrot.lane.b32.xlu1 %v1524_v23, %s1405_s1  ;;  %258 = vrot.lane.b32.xlu0 %v1529_v24, %s1405_s1 }
  0x14   :  { %1247 = vmatmul.mubr.msk.f32.vlgmr.msra.gmra.mrb[0].mxu0 %vm57_vm0, %v40_v29  ;;  %1249 = vmatmul.mubr.msk.f32.vlgmr.msra.gmra.mrb[0].mxu1 %vm57_vm0, %v1248_v30  ;;  %v1412_v29 = vmov 0   ;;  %v940_v30 = vld [vmem:[%s2396_s6] sm:$0xff] }
  0x15   :  { %788 = vmatprep.mubr.f32.mxu1 %v2402_v3  ;;  %717 = vmatprep.mubr.f32.mxu0 %v2402_v3 }
  0x16   :  { %1402 = vset.pattern.permute.xlu0 %v1412_v29 }
  0x17   :  { %294 = vrot.lane.b32.xlu1 %v1510_v20, %s1406_s11  ;;  %292 = vrot.lane.b32.xlu0 %v1515_v21, %s1406_s11 }
  0x1b   :  { %298 = vrot.lane.b32.xlu1 %v1524_v23, %s1406_s11  ;;  %296 = vrot.lane.b32.xlu0 %v1529_v24, %s1406_s11 }
  0x1f   :  { %332 = vrot.lane.b32.xlu1 %v1510_v20, %s1407_s0  ;;  %330 = vrot.lane.b32.xlu0 %v1515_v21, %s1407_s0 }
  0x79   :  { %v217_v31 = vpop.permute.xlu1 %216  ;;  %v215_v34 = vpop.permute.xlu0 %214 }
  0x7a   :  { %v227_v43 = vsel %vm224_vm1, %v215_v34, %v217_v31 }
  0x7b   :  { %v1618_v59 = vmul.f32 %v1593_v48, %v227_v43 }
  0x7d   :  { %v221_v32 = vpop.permute.xlu1 %220  ;;  %v219_v42 = vpop.permute.xlu0 %218  ;;  %2450 = vst [vmem:[#allocation13_spill] sm:$0xff] %v1618_v59 }
  0x7e   :  { %v228_v44 = vsel %vm224_vm1, %v221_v32, %v215_v34  ;;  %v225_v45 = vsel %vm224_vm1, %v219_v42, %v221_v32  ;;  %v226_v47 = vsel %vm224_vm1, %v217_v31, %v219_v42  ;;  %v1805_v42 = vrot.slane %v35_v37, %v1575_v38 }
  0x7f   :  { %v1605_v54 = vmul.f32 %v1588_v46, %v228_v44  ;;  %v1630_v63 = vmul.f32 %v1598_v50, %v226_v47  ;;  %v1648_v8 = vmul.f32 %v1621_v60, %v225_v45 }
  0x81   :  { %v257_v40 = vpop.permute.xlu1 %256  ;;  %v255_v53 = vpop.permute.xlu0 %254  ;;  %2447 = vst [vmem:[#allocation10_spill] sm:$0xff] %v1605_v54  ;;  %2454 = vst [vmem:[#allocation17_spill] sm:$0xff] %v1630_v63  ;;  %v1882_v63 = vld [vmem:[%s2395_s3 + $0x14] sm:$0xf] }
  0x82   :  { %v265_v57 = vsel %vm262_vm2, %v255_v53, %v257_v40  ;;  %2458 = vst [vmem:[#allocation21_spill] sm:$0xff] %v1648_v8 }
  0x83   :  { %v1627_v62 = vmul.f32 %v1611_v56, %v265_v57 }
  0x85   :  { %v261_v51 = vpop.permute.xlu1 %260  ;;  %2453 = vst [vmem:[#allocation16_spill] sm:$0xff] %v1627_v62  ;;  %v259_v2 = vpop.permute.xlu0 %258 }
  0x86   :  { %v266_v58 = vsel %vm262_vm2, %v261_v51, %v255_v53  ;;  %v263_v5 = vsel %vm262_vm2, %v259_v2, %v261_v51  ;;  %v264_v6 = vsel %vm262_vm2, %v257_v40, %v259_v2  ;;  %v1802_v40 = vrot.slane %v34_v33, %v1575_v38 }
  0x87   :  { %v1624_v61 = vmul.f32 %v1608_v55, %v266_v58  ;;  %v1645_v7 = vmul.f32 %v1633_v0, %v264_v6  ;;  %v1651_v9 = vmul.f32 %v1636_v1, %v263_v5 }
  0x89   :  { %2452 = vst [vmem:[#allocation15_spill] sm:$0xff] %v1624_v61  ;;  %2457 = vst [vmem:[#allocation20_spill] sm:$0xff] %v1645_v7  ;;  %v295_v12 = vpop.permute.xlu1 %294  ;;  %v293_v13 = vpop.permute.xlu0 %292 }
  0x8a   :  { %2459 = vst [vmem:[#allocation22_spill] sm:$0xff] %v1651_v9  ;;  %v1660_v14 = vsel %vm300_vm3, %v293_v13, %v295_v12 }
  0x8b   :  { %2460 = vst [vmem:[#allocation23_spill] sm:$0xff] %v1660_v14 }
  0x8d   :  { %v299_v16 = vpop.permute.xlu1 %298  ;;  %v297_v17 = vpop.permute.xlu0 %296 }
  0x8e   :  { %v1666_v18 = vsel %vm300_vm3, %v299_v16, %v293_v13  ;;  %v1670_v19 = vsel %vm300_vm3, %v297_v17, %v299_v16  ;;  %v1674_v22 = vsel %vm300_vm3, %v295_v12, %v297_v17 }
  0x8f   :  { %2461 = vst [vmem:[#allocation24_spill] sm:$0xff] %v1674_v22  ;;  %v1816_v47 = vmul.f32 %v1802_v40, %v1666_v18 }
  0x91   :  { %v1787_v31 = vpop.permute.xlu1 %332  ;;  %v1789_v32 = vpop.permute.xlu0 %330  ;;  %2464 = vst [vmem:[#allocation27_spill] sm:$0xff] %v1816_v47 }
  0x92   :  { %2462 = vst [vmem:[#allocation25_spill] sm:$0xff] %v1787_v31  ;;  %2463 = vst [vmem:[#allocation26_spill] sm:$0xff] %v1789_v32 }
  0xe7   :  { %v1676_v25 = vpop.f32.mrb[0].mxu0  ;;  %v1678_v26 = vpop.f32.mrb[0].mxu1 }
  0xe8   :  { %525 = vrot.lane.b32.xlu1 %v1678_v26, %s1404_s20  ;;  %521 = vrot.lane.b32.xlu0 %v1676_v25, %s1404_s20  ;;  %v1684_v27 = vpop.f32.mrb[1].mxu0  ;;  %v1686_v28 = vpop.f32.mrb[1].mxu1 }
  0xec   :  { %336 = vrot.lane.b32.xlu1 %v1524_v23, %s1407_s0  ;;  %537 = vrot.lane.b32.xlu0 %v1676_v25, %s1405_s1 }
  0xf0   :  { %370 = vrot.lane.b32.xlu1 %v1510_v20, %s1408_s16  ;;  %541 = vrot.lane.b32.xlu0 %v1678_v26, %s1405_s1 }
  0xf4   :  { %374 = vrot.lane.b32.xlu1 %v1524_v23, %s1408_s16  ;;  %553 = vrot.lane.b32.xlu0 %v1676_v25, %s1406_s11 }
  0xf8   :  { %408 = vrot.lane.b32.xlu1 %v1510_v20, %s1409_s17  ;;  %557 = vrot.lane.b32.xlu0 %v1678_v26, %s1406_s11 }
  0xfc   :  { %527 = vrot.lane.b32.xlu1 %v1686_v28, %s1404_s20  ;;  %569 = vrot.lane.b32.xlu0 %v1676_v25, %s1407_s0 }
 0x100   :  { %573 = vrot.lane.b32.xlu0 %v1678_v26, %s1407_s0  ;;  %539 = vrot.lane.b32.xlu1 %v1684_v27, %s1405_s1 }
 0x104   :  { %585 = vrot.lane.b32.xlu0 %v1676_v25, %s1408_s16  ;;  %543 = vrot.lane.b32.xlu1 %v1686_v28, %s1405_s1 }
 0x108   :  { %589 = vrot.lane.b32.xlu0 %v1678_v26, %s1408_s16  ;;  %555 = vrot.lane.b32.xlu1 %v1684_v27, %s1406_s11 }
 0x10c   :  { %601 = vrot.lane.b32.xlu0 %v1676_v25, %s1409_s17  ;;  %559 = vrot.lane.b32.xlu1 %v1686_v28, %s1406_s11 }
 0x110   :  { %605 = vrot.lane.b32.xlu0 %v1678_v26, %s1409_s17  ;;  %571 = vrot.lane.b32.xlu1 %v1684_v27, %s1407_s0 }
 0x114   :  { %617 = vrot.lane.b32.xlu0 %v1676_v25, %s1410_s18  ;;  %575 = vrot.lane.b32.xlu1 %v1686_v28, %s1407_s0 }
 0x118   :  { %621 = vrot.lane.b32.xlu0 %v1678_v26, %s1410_s18  ;;  %587 = vrot.lane.b32.xlu1 %v1684_v27, %s1408_s16 }
 0x11c   :  { %633 = vrot.lane.b32.xlu0 %v1676_v25, %s1411_s19  ;;  %591 = vrot.lane.b32.xlu1 %v1686_v28, %s1408_s16 }
 0x120   :  { %637 = vrot.lane.b32.xlu0 %v1678_v26, %s1411_s19  ;;  %603 = vrot.lane.b32.xlu1 %v1684_v27, %s1409_s17 }
 0x124   :  { %607 = vrot.lane.b32.xlu1 %v1686_v28, %s1409_s17  ;;  %523 = vrot.lane.b32.xlu0 %v1684_v27, %s1404_s20 }
 0x128   :  { %619 = vrot.lane.b32.xlu1 %v1684_v27, %s1410_s18  ;;  %334 = vrot.lane.b32.xlu0 %v1529_v24, %s1407_s0 }
 0x12c   :  { %623 = vrot.lane.b32.xlu1 %v1686_v28, %s1410_s18  ;;  %368 = vrot.lane.b32.xlu0 %v1515_v21, %s1408_s16 }
 0x130   :  { %635 = vrot.lane.b32.xlu1 %v1684_v27, %s1411_s19  ;;  %372 = vrot.lane.b32.xlu0 %v1529_v24, %s1408_s16 }
 0x134   :  { %639 = vrot.lane.b32.xlu1 %v1686_v28, %s1411_s19  ;;  %406 = vrot.lane.b32.xlu0 %v1515_v21, %s1409_s17 }
 0x138   :  { %412 = vrot.lane.b32.xlu1 %v1524_v23, %s1409_s17  ;;  %410 = vrot.lane.b32.xlu0 %v1529_v24, %s1409_s17 }
 0x13c   :  { %446 = vrot.lane.b32.xlu1 %v1510_v20, %s1410_s18  ;;  %444 = vrot.lane.b32.xlu0 %v1515_v21, %s1410_s18 }
 0x140   :  { %450 = vrot.lane.b32.xlu1 %v1524_v23, %s1410_s18  ;;  %448 = vrot.lane.b32.xlu0 %v1529_v24, %s1410_s18 }
 0x144   :  { %484 = vrot.lane.b32.xlu1 %v1510_v20, %s1411_s19  ;;  %482 = vrot.lane.b32.xlu0 %v1515_v21, %s1411_s19 }
 0x148   :  { %488 = vrot.lane.b32.xlu1 %v1524_v23, %s1411_s19  ;;  %486 = vrot.lane.b32.xlu0 %v1529_v24, %s1411_s19  ;;  %v1853_v23 = vrot.slane %v34_v33, %v1595_v49 }
 0x14c   :  { %943 = vperm.xlu0 %1402, %v940_v30  }
 0x15a   :  { %v1794_v34 = vpop.permute.xlu1 %525  ;;  %v1796_v36 = vpop.permute.xlu0 %521 }
 0x15e   :  { %v1808_v43 = vpop.permute.xlu1 %336  ;;  %v538_v44 = vpop.permute.xlu0 %537 }
 0x15f   :  { %v342_v45 = vsel %vm338_vm4, %v1808_v43, %v1789_v32 }
 0x160   :  { %v1819_v51 = vmul.f32 %v1805_v42, %v342_v45 }
 0x162   :  { %2465 = vst [vmem:[#allocation28_spill] sm:$0xff] %v1819_v51  ;;  %v1823_v53 = vpop.permute.xlu1 %370  ;;  %v542_v57 = vpop.permute.xlu0 %541 }
 0x163   :  { %2466 = vst [vmem:[#allocation29_spill] sm:$0xff] %v1823_v53 }
 0x166   :  { %v1825_v58 = vpop.permute.xlu1 %374  ;;  %v1827_v2 = vpop.permute.xlu0 %553 }
 0x167   :  { %2467 = vst [vmem:[#allocation30_spill] sm:$0xff] %v1825_v58  ;;  %v1922_v58 = vrot.slane %v1882_v63, %v1577_v39 }
 0x16a   :  { %v1829_v5 = vpop.permute.xlu1 %408  ;;  %v1831_v6 = vpop.permute.xlu0 %557 }
 0x16b   :  { %2468 = vst [vmem:[#allocation31_spill] sm:$0xff] %v1829_v5 }
 0x16e   :  { %v528_v12 = vpop.permute.xlu1 %527  ;;  %v1833_v13 = vpop.permute.xlu0 %569 }
 0x16f   :  { %v529_v18 = vsel %vm224_vm1, %v1794_v34, %v528_v12  ;;  %v532_v59 = vsel %vm224_vm1, %v528_v12, %v1796_v36  ;;  %v1916_v12 = vrot.slane %v1882_v63, %v1575_v38 }
 0x170   :  { %v536_v52 = vmul.f32 %v529_v18, %v1621_v60  ;;  %v1873_v60 = vrot.slane %v35_v37, %v1577_v39 }
 0x171   :  { %2472 = vst [vmem:[#allocation35_spill] sm:$0xff] %v1916_v12 }
 0x172   :  { %v574_v16 = vpop.permute.xlu0 %573  ;;  %v540_v17 = vpop.permute.xlu1 %539  ;;  %2469 = vst [vmem:[#allocation32_spill] sm:$0xff] %v1873_v60 }
 0x173   :  { %v546_v9 = vsel %vm262_vm2, %v540_v17, %v542_v57  ;;  %v547_v22 = vsel %vm262_vm2, %v538_v44, %v540_v17 }
 0x174   :  { %v550_v31 = vmul.f32 %v547_v22, %v1611_v56 }
 0x176   :  { %v1838_v29 = vpop.permute.xlu0 %585  ;;  %v544_v30 = vpop.permute.xlu1 %543 }
 0x177   :  { %v545_v45 = vsel %vm262_vm2, %v542_v57, %v544_v30  ;;  %v548_v54 = vsel %vm262_vm2, %v544_v30, %v538_v44  ;;  %v38_v30 = vld [vmem:[%s2395_s3 + $0x18] sm:$0xf]  ;;  %v1928_v57 = vrot.slane %v1882_v63, %v1595_v49  ;;  %v533_v44 = vmul.f32 %v532_v59, %v1588_v46 }
 0x178   :  { %v552_v3 = vmul.f32 %v545_v45, %v1636_v1  ;;  %v1870_v1 = vmul.f32 %v1853_v23, %v1670_v19  ;;  %v1888_v19 = vrot.slane %v35_v37, %v1595_v49  ;;  %v549_v14 = vmul.f32 %v548_v54, %v1608_v55 }
 0x179   :  { %v1932_v54 = vrot.slane %v38_v30, %v1575_v38  ;;  %v1940_v55 = vrot.slane %v38_v30, %v1577_v39  ;;  %v1943_v32 = vrot.slane %v38_v30, %v1579_v41  ;;  %v1950_v59 = vrot.slane %v38_v30, %v1595_v49 }
 0x17a   :  { %v1844_v4 = vpop.permute.xlu0 %589  ;;  %v556_v11 = vpop.permute.xlu1 %555  ;;  %v1308_v10 = vpack.c.bf16 %v552_v3, %v536_v52  ;;  %v36_v3 = vld [vmem:[%s2395_s3 + $0x10] sm:$0xf]  ;;  %v1866_v52 = vrot.slane %v34_v33, %v1579_v41  ;;  %v1294_v46 = vpack.c.bf16 %v549_v14, %v533_v44 }
 0x17b   :  { %v1892_v7 = vrot.slane %v36_v3, %v1575_v38  ;;  %v1901_v62 = vrot.slane %v36_v3, %v1577_v39  ;;  %v1904_v8 = vrot.slane %v36_v3, %v1579_v41  ;;  %v563_v12 = vsel %vm300_vm3, %v1827_v2, %v556_v11 }
 0x17c   :  { %1309 = vmatprep.subr.bf16.mxu1 %v1308_v10  ;;  %v1863_v10 = vrot.slane %v34_v33, %v1577_v39  ;;  %v1885_v33 = vrot.slane %v35_v37, %v1579_v41  ;;  %v1907_v37 = vrot.slane %v36_v3, %v1595_v49 }
 0x17e   :  { %v1846_v15 = vpop.permute.xlu0 %601  ;;  %v560_v21 = vpop.permute.xlu1 %559  ;;  %2471 = vst [vmem:[#allocation34_spill] sm:$0xff] %v1885_v33 }
 0x182   :  { %v1848_v47 = vpop.permute.xlu0 %605  ;;  %v572_v51 = vpop.permute.xlu1 %571 }
 0x183   :  { %v579_v17 = vsel %vm338_vm4, %v1833_v13, %v572_v51  ;;  %v578_v38 = vsel %vm338_vm4, %v572_v51, %v574_v16  ;;  %v564_v51 = vsel %vm300_vm3, %v560_v21, %v1827_v2 }
 0x184   :  { %v582_v14 = vmul.f32 %v579_v17, %v1873_v60  ;;  %v566_v17 = vmul.f32 %v563_v12, %v1863_v10 }
 0x186   :  { %v1850_v24 = vpop.permute.xlu0 %617  ;;  %v576_v20 = vpop.permute.xlu1 %575 }
 0x187   :  { %v577_v22 = vsel %vm338_vm4, %v574_v16, %v576_v20  ;;  %v580_v30 = vsel %vm338_vm4, %v576_v20, %v1833_v13 }
 0x188   :  { %v584_v2 = vmul.f32 %v577_v22, %v1888_v19 }
 0x18a   :  { %v1855_v18 = vpop.permute.xlu0 %621  ;;  %v1857_v45 = vpop.permute.xlu1 %587 }
 0x18b   :  { %v594_v16 = vsel %vm376_vm5, %v1857_v45, %v1844_v4  ;;  %v595_v12 = vsel %vm376_vm5, %v1838_v29, %v1857_v45 }
 0x18e   :  { %v1877_v61 = vpop.permute.xlu0 %633  ;;  %v592_v5 = vpop.permute.xlu1 %591 }
 0x18f   :  { %2470 = vst [vmem:[#allocation33_spill] sm:$0xff] %v1877_v61  ;;  %v551_v61 = vmul.f32 %v546_v9, %v1633_v0  ;;  %v561_v9 = vsel %vm300_vm3, %v1831_v6, %v560_v21  ;;  %v596_v20 = vsel %vm376_vm5, %v592_v5, %v1838_v29 }
 0x192   :  { %v1918_v53 = vpop.permute.xlu0 %637  ;;  %v1924_v3 = vpop.permute.xlu1 %603 }
 0x193   :  { %2473 = vst [vmem:[#allocation36_spill] sm:$0xff] %v1918_v53  ;;  %v562_v53 = vsel %vm300_vm3, %v556_v11, %v1831_v6  ;;  %v583_v11 = vmul.f32 %v578_v38, %v1885_v33  ;;  %v581_v33 = vmul.f32 %v580_v30, %v1805_v42 }
 0x194   :  { %v567_v56 = vmul.f32 %v562_v53, %v1866_v52  ;;  %v593_v53 = vsel %vm376_vm5, %v1844_v4, %v592_v5 }
 0x196   :  { %v608_v44 = vpop.permute.xlu1 %607  ;;  %v524_v0 = vpop.permute.xlu0 %523 }
 0x197   :  { %v530_v6 = vsel %vm224_vm1, %v524_v0, %v1794_v34  ;;  %v531_v21 = vsel %vm224_vm1, %v1796_v36, %v524_v0  ;;  %v565_v34 = vmul.f32 %v564_v51, %v1802_v40  ;;  %v568_v0 = vmul.f32 %v561_v9, %v1853_v23 }
 0x198   :  { %v534_v38 = vmul.f32 %v531_v21, %v1593_v48  ;;  %v535_v13 = vmul.f32 %v530_v6, %v1598_v50  ;;  %v598_v36 = vmul.f32 %v594_v16, %v1901_v62  ;;  %v600_v51 = vmul.f32 %v596_v20, %v1907_v37 }
 0x199   :  { %v1314_v9 = vpack.c.bf16 %v583_v11, %v567_v56  ;;  %v1312_v30 = vpack.c.bf16 %v584_v2, %v568_v0  ;;  %v1296_v16 = vpack.c.bf16 %v582_v14, %v566_v17  ;;  %v1298_v29 = vpack.c.bf16 %v581_v33, %v565_v34 }
 0x19a   :  { %v1310_v22 = vpack.c.bf16 %v551_v61, %v535_v13  ;;  %v620_v60 = vpop.permute.xlu1 %619  ;;  %v1993_v49 = vpop.permute.xlu0 %334  ;;  %v1292_v39 = vpack.c.bf16 %v550_v31, %v534_v38  ;;  %v612_v31 = vsel %vm414_vm7, %v608_v44, %v1846_v15  ;;  %v599_v56 = vmul.f32 %v593_v53, %v1904_v8  ;;  %v2475_v53 = vld [vmem:[#allocation9_spill] sm:$0xff] }
 0x19b   :  { %v339_v61 = vsel %vm338_vm4, %v1993_v49, %v1808_v43  ;;  %v626_v4 = vsel %vm452_vm6, %v620_v60, %v1855_v18  ;;  %v597_v43 = vmul.f32 %v595_v12, %v1892_v7  ;;  %v1300_v33 = vpack.c.bf16 %v598_v36, %v1684_v27 }
 0x19c   :  { %1293 = vmatprep.subr.bf16.mxu0 %v1292_v39  ;;  %v2014_v5 = vmul.f32 %v1888_v19, %v339_v61  ;;  %1311 = vmatpush1.bf16.msra.mxu1 %v1310_v22  ;;  %v610_v14 = vsel %vm414_vm7, %v1924_v3, %v1848_v47  ;;  %v616_v11 = vmul.f32 %v612_v31, %v1928_v57  ;;  %v2474_v22 = vld [vmem:[#allocation7_spill] sm:$0xff]  ;;  %v2477_v31 = vld [vmem:[#allocation36_spill] sm:$0xff] }
 0x19d   :  { %1295 = vmatpush1.bf16.msra.mxu0 %v1294_v46  ;;  %1313 = vmatprep.subr.bf16.mxu1 %v1312_v30  ;;  %v1316_v6 = vpack.c.bf16 %v600_v51, %v1686_v28  ;;  %v627_v21 = vsel %vm452_vm6, %v1850_v24, %v620_v60  ;;  %v630_v2 = vmul.f32 %v626_v4, %v1940_v55  ;;  %v2476_v51 = vld [vmem:[#allocation35_spill] sm:$0xff] }
 0x19e   :  { %v624_v45 = vpop.permute.xlu1 %623  ;;  %1297 = vmatprep.subr.bf16.mxu0 %v1296_v16  ;;  %v2018_v39 = vpop.permute.xlu0 %368  ;;  %v611_v38 = vsel %vm414_vm7, %v1846_v15, %v1924_v3  ;;  %v2044_v28 = vrot.slane %v1882_v63, %v1579_v41  ;;  %v1344_v60 = vpack.c.bf16 %v2014_v5, %v1870_v1  ;;  %v609_v13 = vsel %vm414_vm7, %v1848_v47, %v608_v44 }
 0x19f   :  { %v628_v46 = vsel %vm452_vm6, %v624_v45, %v1850_v24  ;;  %v625_v27 = vsel %vm452_vm6, %v1855_v18, %v624_v45  ;;  %v39_v24 = vld [vmem:[%s2395_s3 + $0x1c] sm:$0xf]  ;;  %v614_v18 = vmul.f32 %v610_v14, %v1922_v58  ;;  %v1302_v17 = vpack.c.bf16 %v597_v43, %v1676_v25 }
 0x1a0   :  { %v632_v20 = vmul.f32 %v628_v46, %v1950_v59  ;;  %1315 = vmatpush1.bf16.msra.mxu1 %v1314_v9  ;;  %v1318_v34 = vpack.c.bf16 %v599_v56, %v1678_v26  ;;  %v629_v0 = vmul.f32 %v627_v21, %v1932_v54  ;;  %v631_v36 = vmul.f32 %v625_v27, %v1943_v32  ;;  %v2478_v26 = vld [vmem:[#allocation6_spill] sm:$0xff]  ;;  %v2479_v45 = vld [vmem:[#allocation33_spill] sm:$0xff] }
 0x1a1   :  { %1299 = vmatpush1.bf16.msra.mxu0 %v1298_v29  ;;  %1317 = vmatprep.subr.bf16.mxu1 %v1316_v6  ;;  %v2061_v12 = vrot.slane %v39_v24, %v2474_v22  ;;  %v2064_v47 = vrot.slane %v39_v24, %v2475_v53  ;;  %v1304_v44 = vpack.c.bf16 %v630_v2, %v614_v18  ;;  %v2480_v21 = vld [vmem:[#allocation25_spill] sm:$0xff]  ;;  %v2481_v2 = vld [vmem:[#allocation26_spill] sm:$0xff] }
 0x1a2   :  { %v636_v63 = vpop.permute.xlu1 %635  ;;  %1301 = vmatprep.subr.bf16.mxu0 %v1300_v33  ;;  %v373_v15 = vpop.permute.xlu0 %372  ;;  %v1320_v3 = vpack.c.bf16 %v632_v20, %v616_v11  ;;  %v613_v61 = vmul.f32 %v611_v38, %v2476_v51  ;;  %v615_v9 = vmul.f32 %v609_v13, %v2044_v28  ;;  %v2072_v30 = vrot.slane %v39_v24, %v2478_v26  ;;  %v2486_v53 = vld [vmem:[#allocation34_spill] sm:$0xff] }
 0x1a3   :  { %v642_v25 = vsel %vm490_vm8, %v636_v63, %v2477_v31  ;;  %v2077_v56 = vrot.slane %v39_v24, %v1579_v41  ;;  %v643_v14 = vsel %vm490_vm8, %v2479_v45, %v636_v63  ;;  %v341_v41 = vsel %vm338_vm4, %v2481_v2, %v2480_v21  ;;  %v2482_v24 = vld [vmem:[#allocation30_spill] sm:$0xff]  ;;  %v2483_v63 = vld [vmem:[#allocation29_spill] sm:$0xff] }
 0x1a4   :  { %1319 = vmatpush1.bf16.msra.mxu1 %v1318_v34  ;;  %v1306_v4 = vpack.c.bf16 %v629_v0, %v613_v61  ;;  %v1322_v43 = vpack.c.bf16 %v631_v36, %v615_v9  ;;  %v646_v11 = vmul.f32 %v642_v25, %v2061_v12  ;;  %v340_v27 = vsel %vm338_vm4, %v2480_v21, %v1993_v49  ;;  %v2484_v34 = vld [vmem:[#allocation23_spill] sm:$0xff]  ;;  %v2485_v36 = vld [vmem:[#allocation32_spill] sm:$0xff]  ;;  %v2495_v21 = vld [vmem:[#allocation17_spill] sm:$0xff] }
 0x1a5   :  { %1303 = vmatpush1.bf16.msra.mxu0 %v1302_v17  ;;  %1321 = vmatprep.subr.bf16.mxu1 %v1320_v3  ;;  %v380_v18 = vsel %vm376_vm5, %v2482_v24, %v2018_v39  ;;  %v645_v13 = vmul.f32 %v643_v14, %v2072_v30  ;;  %v378_v3 = vsel %vm376_vm5, %v2483_v63, %v373_v15  ;;  %v520_v17 = vld [vmem:[%s2397_s5] sm:$0xff]  ;;  %v2487_v61 = vld [vmem:[#allocation24_spill] sm:$0xff] }
 0x1a6   :  { %v640_v16 = vpop.permute.xlu1 %639  ;;  %1305 = vmatprep.subr.bf16.mxu0 %v1304_v44  ;;  %v2074_v29 = vpop.permute.xlu0 %406  ;;  %v327_v0 = vmul.f32 %v1863_v10, %v2484_v34  ;;  %v365_v22 = vmul.f32 %v2485_v36, %v341_v41  ;;  %v366_v44 = vmul.f32 %v2486_v53, %v340_v27  ;;  %v328_v9 = vmul.f32 %v1866_v52, %v2487_v61 }
 0x1a7   :  { %v644_v33 = vsel %vm490_vm8, %v640_v16, %v2479_v45  ;;  %v641_v46 = vsel %vm490_vm8, %v2477_v31, %v640_v16  ;;  %v379_v31 = vsel %vm376_vm5, %v2018_v39, %v2483_v63  ;;  %v405_v25 = vmul.f32 %v1907_v37, %v380_v18  ;;  %v2492_v39 = vld [vmem:[#allocation13_spill] sm:$0xff] }
 0x1a8   :  { %v648_v6 = vmul.f32 %v644_v33, %v2064_v47  ;;  %1323 = vmatpush1.bf16.msra.mxu1 %v1322_v43  ;;  %v647_v49 = vmul.f32 %v641_v46, %v2077_v56  ;;  %v377_v26 = vsel %vm376_vm5, %v373_v15, %v2482_v24  ;;  %v403_v16 = vmul.f32 %v1901_v62, %v378_v3  ;;  %v2489_v43 = vld [vmem:[#allocation21_spill] sm:$0xff]  ;;  %v2498_v3 = vld [vmem:[#allocation15_spill] sm:$0xff] }
 0x1a9   :  { %1307 = vmatpush1.bf16.msra.mxu0 %v1306_v4  ;;  %v2488_v4 = vld [vmem:[#allocation22_spill] sm:$0xff]  ;;  %v1346_v41 = vpack.c.bf16 %v366_v44, %v328_v9  ;;  %v1328_v27 = vpack.c.bf16 %v365_v22, %v327_v0  ;;  %v402_v24 = vmul.f32 %v1892_v7, %v379_v31  ;;  %v404_v18 = vmul.f32 %v1904_v8, %v377_v26 }
 0x1aa   :  { %v413_v20 = vpop.permute.xlu1 %412  ;;  %669 = vmatprep.subr.mxu0 %v646_v11  ;;  %740 = vmatprep.subr.mxu1 %v648_v6  ;;  %v411_v38 = vpop.permute.xlu0 %410  ;;  %v2490_v45 = vpack.c.bf16 %v2488_v4, %v2489_v43  ;;  %v2491_v11 = vld [vmem:[#allocation16_spill] sm:$0xff]  ;;  %v2501_v44 = vmov 0.0   ;;  %v2503_v22 = vld [vmem:[#allocation2_spill] sm:$0xff]  ;;  %v2504_v43 = vld [vmem:[#allocation5_spill] sm:$0xff] }
 0x1ab   :  { %v2493_v46 = vpack.c.bf16 %v2491_v11, %v2492_v39  ;;  %v2494_v6 = vld [vmem:[#allocation20_spill] sm:$0xff]  ;;  %v418_v15 = vsel %vm414_vm7, %v413_v20, %v2074_v29  ;;  %v1332_v61 = vpack.c.bf16 %v403_v16, %v2503_v22 }
 0x1ac   :  { %741 = vmatpush1.msra.mxu1 %v647_v49  ;;  %v2496_v2 = vpack.c.bf16 %v2494_v6, %v2495_v21  ;;  %v2499_v49 = vld [vmem:[#allocation10_spill] sm:$0xff]  ;;  %v443_v9 = vmul.f32 %v1928_v57, %v418_v15  ;;  %v2505_v39 = vld [vmem:[#allocation28_spill] sm:$0xff]  ;;  %v2508_v15 = vld [vmem:[#allocation3_spill] sm:$0xff] }
 0x1ad   :  { %670 = vmatpush1.msra.mxu0 %v645_v13  ;;  %1341 = vmatprep.subr.bf16.mxu1 %v2490_v45  ;;  %v2497_v13 = vld [vmem:[#allocation31_spill] sm:$0xff]  ;;  %v2500_v34 = vpack.c.bf16 %v2498_v3, %v2499_v49  ;;  %v1350_v45 = vpack.c.bf16 %v404_v18, %v2504_v43 }
 0x1ae   :  { %v447_v33 = vpop.permute.xlu1 %446  ;;  %1253 = vmatmul.mubr.msk.f32.vlgmr.msra.gmra.mrb[2].mxu1 %vm649_vm9, %v520_v17  ;;  %v445_v14 = vpop.permute.xlu0 %444  ;;  %1325 = vmatprep.subr.bf16.mxu0 %v2493_v46  ;;  %v416_v63 = vsel %vm414_vm7, %v2497_v13, %v411_v38  ;;  %v2506_v46 = vld [vmem:[#allocation27_spill] sm:$0xff]  ;;  %v417_v21 = vsel %vm414_vm7, %v2074_v29, %v2497_v13 }
 0x1af   :  { %1343 = vmatpush1.bf16.msra.mxu1 %v2496_v2  ;;  %1252 = vmatmul.mubr.msk.f32.vlgmr.msra.gmra.mrb[2].mxu0 %vm649_vm9, %v520_v17  ;;  %v415_v17 = vsel %vm414_vm7, %v411_v38, %v413_v20  ;;  %v441_v38 = vmul.f32 %v1922_v58, %v416_v63  ;;  %v2507_v6 = vpack.c.bf16 %v2505_v39, %v2506_v46 }
 0x1b0   :  { %1345 = vmatprep.subr.bf16.mxu1 %v1344_v60  ;;  %1327 = vmatpush1.bf16.msra.mxu0 %v2500_v34  ;;  %v2502_v60 = vld [vmem:[#allocation4_spill] sm:$0xff]  ;;  %v442_v18 = vmul.f32 %v2044_v28, %v415_v17  ;;  %v440_v3 = vmul.f32 %v2476_v51, %v417_v21 }
 0x1b1   :  { %862 = vmatprep.mubr.f32.mxu0 %v2501_v44  ;;  %1329 = vmatprep.subr.bf16.mxu0 %v1328_v27  ;;  %v1348_v0 = vpack.c.bf16 %v405_v25, %v2502_v60  ;;  %v455_v25 = vsel %vm452_vm6, %v445_v14, %v447_v33  ;;  %v1334_v27 = vpack.c.bf16 %v402_v24, %v2508_v15 }
 0x1b2   :  { %v451_v1 = vpop.permute.xlu1 %450  ;;  %v449_v5 = vpop.permute.xlu0 %448  ;;  %933 = vmatprep.mubr.f32.mxu1 %v2501_v44  ;;  %v478_v63 = vmul.f32 %v1932_v54, %v455_v25 }
 0x1b3   :  { %v456_v31 = vsel %vm452_vm6, %v451_v1, %v445_v14  ;;  %1347 = vmatpush1.bf16.msra.mxu1 %v1346_v41  ;;  %v453_v26 = vsel %vm452_vm6, %v449_v5, %v451_v1  ;;  %v454_v20 = vsel %vm452_vm6, %v447_v33, %v449_v5 }
 0x1b4   :  { %v481_v16 = vmul.f32 %v1950_v59, %v456_v31  ;;  %v479_v4 = vmul.f32 %v1940_v55, %v454_v20  ;;  %1349 = vmatprep.subr.bf16.mxu1 %v1348_v0  ;;  %v480_v11 = vmul.f32 %v1943_v32, %v453_v26  ;;  %1331 = vmatpush1.bf16.msra.mxu0 %v2507_v6  ;;  %v1083_v6 = vld [vmem:[%s2399_s8] sm:$0xff] }
 0x1b5   :  { %1333 = vmatprep.subr.bf16.mxu0 %v1332_v61  ;;  %v1338_v13 = vpack.c.bf16 %v478_v63, %v440_v3  ;;  %v213_v61 = vld [vmem:[%s2398_s4] sm:$0xff] }
 0x1b6   :  { %v485_v33 = vpop.permute.xlu1 %484  ;;  %v483_v14 = vpop.permute.xlu0 %482  ;;  %v1336_v2 = vpack.c.bf16 %v479_v4, %v441_v38  ;;  %v1352_v41 = vpack.c.bf16 %v481_v16, %v443_v9  ;;  %v1354_v49 = vpack.c.bf16 %v480_v11, %v442_v18 }
 0x1b7   :  { %1351 = vmatpush1.bf16.msra.mxu1 %v1350_v45  ;;  %v493_v5 = vsel %vm490_vm8, %v483_v14, %v485_v33 }
 0x1b8   :  { %1353 = vmatprep.subr.bf16.mxu1 %v1352_v41  ;;  %1335 = vmatpush1.bf16.msra.mxu0 %v1334_v27  ;;  %v516_v9 = vmul.f32 %v2072_v30, %v493_v5 }
 0x1b9   :  { %1337 = vmatprep.subr.bf16.mxu0 %v1336_v2 }
 0x1ba   :  { %v489_v34 = vpop.permute.xlu1 %488  ;;  %v487_v29 = vpop.permute.xlu0 %486 }
 0x1bb   :  { %v494_v1 = vsel %vm490_vm8, %v489_v34, %v483_v14  ;;  %1355 = vmatpush1.bf16.msra.mxu1 %v1354_v49  ;;  %v491_v24 = vsel %vm490_vm8, %v487_v29, %v489_v34  ;;  %v492_v17 = vsel %vm490_vm8, %v485_v33, %v487_v29  ;;  %v2509_v29 = vld [vmem:[#allocation12_spill] sm:$0xff] }
 0x1bc   :  { %v519_v60 = vmul.f32 %v2064_v47, %v494_v1  ;;  %v517_v0 = vmul.f32 %v2061_v12, %v492_v17  ;;  %v518_v22 = vmul.f32 %v2077_v56, %v491_v24  ;;  %1339 = vmatpush1.bf16.msra.mxu0 %v1338_v13 }
 0x1be   :  { %814 = vmatprep.subr.mxu0 %v517_v0  ;;  %885 = vmatprep.subr.mxu1 %v519_v60 }
 0x1bf   :  { %886 = vmatpush1.msra.mxu1 %v518_v22  ;;  %v2510_v22 = vld [vmem:[#allocation18_spill] sm:$0xff] }
 0x1c0   :  { %1255 = vmatmul.mubr.msk.f32.vlgmr.msra.gmra.mrb[2].mxu1 %vm649_vm9, %v213_v61  ;;  %815 = vmatpush1.msra.mxu0 %v516_v9 }
 0x1c1   :  { %1227 = vmatprep.mubr.f32.mxu1 %v2501_v44  ;;  %1254 = vmatmul.mubr.msk.f32.vlgmr.msra.gmra.mrb[2].mxu0 %vm649_vm9, %v213_v61 }
 0x1c2   :  { %1156 = vmatprep.mubr.f32.mxu0 %v2501_v44 }
 0x1cb   :  { %v944_v31 = vpop.permute.xlu0 %943 }
 0x293   :  { %v935_v26 = vpop.f32.mrb[2].mxu1 }
 0x294   :  { %v948_v20 = vadd.f32 %v944_v31, %v935_v26  ;;  %v937_v38 = vpop.f32.mrb[3].mxu1  ;;  %v864_v25 = vpop.f32.mrb[2].mxu0 }
 0x295   :  { %v946_v16 = vadd.f32 %v944_v31, %v864_v25  ;;  %v866_v43 = vpop.f32.mrb[3].mxu0  ;;  %v949_v44 = vadd.f32 %v944_v31, %v937_v38  ;;  %v2513_v25 = vld [vmem:[#allocation11_spill] sm:$0xff] }
 0x296   :  { %v2200_v4 = vmax.f32 %v948_v20, 0.0  ;;  %v947_v11 = vadd.f32 %v944_v31, %v866_v43  ;;  %v2511_v31 = vld [vmem:[#allocation8_spill] sm:$0xff]  ;;  %v2512_v20 = vld [vmem:[#allocation14_spill] sm:$0xff]  ;;  %v2514_v43 = vld [vmem:[#allocation19_spill] sm:$0xff] }
 0x297   :  { %v2202_v45 = vmax.f32 %v946_v16, 0.0  ;;  %v2214_v46 = vmax.f32 %v949_v44, 0.0 }
 0x298   :  { %959 = vrot.lane.b32.xlu0 %v2200_v4, %s1404_s20  ;;  %v2208_v39 = vmax.f32 %v947_v11, 0.0 }
 0x299   :  { %955 = vrot.lane.b32.xlu1 %v2202_v45, %s1404_s20 }
 0x29c   :  { %971 = vrot.lane.b32.xlu0 %v2202_v45, %s1405_s1 }
 0x29d   :  { %957 = vrot.lane.b32.xlu1 %v2208_v39, %s1404_s20 }
 0x2a0   :  { %975 = vrot.lane.b32.xlu0 %v2200_v4, %s1405_s1 }
 0x2a1   :  { %961 = vrot.lane.b32.xlu1 %v2214_v46, %s1404_s20 }
 0x2a4   :  { %987 = vrot.lane.b32.xlu0 %v2202_v45, %s1406_s11 }
 0x2a5   :  { %973 = vrot.lane.b32.xlu1 %v2208_v39, %s1405_s1 }
 0x2a8   :  { %991 = vrot.lane.b32.xlu0 %v2200_v4, %s1406_s11 }
 0x2a9   :  { %977 = vrot.lane.b32.xlu1 %v2214_v46, %s1405_s1 }
 0x2ac   :  { %1003 = vrot.lane.b32.xlu0 %v2202_v45, %s1407_s0 }
 0x2ad   :  { %989 = vrot.lane.b32.xlu1 %v2208_v39, %s1406_s11 }
 0x2b0   :  { %1007 = vrot.lane.b32.xlu0 %v2200_v4, %s1407_s0 }
 0x2b1   :  { %993 = vrot.lane.b32.xlu1 %v2214_v46, %s1406_s11 }
 0x2b4   :  { %1019 = vrot.lane.b32.xlu0 %v2202_v45, %s1408_s16 }
 0x2b5   :  { %1005 = vrot.lane.b32.xlu1 %v2208_v39, %s1407_s0 }
 0x2b8   :  { %1023 = vrot.lane.b32.xlu0 %v2200_v4, %s1408_s16 }
 0x2b9   :  { %1009 = vrot.lane.b32.xlu1 %v2214_v46, %s1407_s0 }
 0x2bc   :  { %1035 = vrot.lane.b32.xlu0 %v2202_v45, %s1409_s17 }
 0x2bd   :  { %1021 = vrot.lane.b32.xlu1 %v2208_v39, %s1408_s16 }
 0x2c0   :  { %1039 = vrot.lane.b32.xlu0 %v2200_v4, %s1409_s17 }
 0x2c1   :  { %1025 = vrot.lane.b32.xlu1 %v2214_v46, %s1408_s16 }
 0x2c4   :  { %1051 = vrot.lane.b32.xlu0 %v2202_v45, %s1410_s18 }
 0x2c5   :  { %1037 = vrot.lane.b32.xlu1 %v2208_v39, %s1409_s17 }
 0x2c8   :  { %1055 = vrot.lane.b32.xlu0 %v2200_v4, %s1410_s18 }
 0x2c9   :  { %1041 = vrot.lane.b32.xlu1 %v2214_v46, %s1409_s17 }
 0x2cc   :  { %1067 = vrot.lane.b32.xlu0 %v2202_v45, %s1411_s19 }
 0x2cd   :  { %1053 = vrot.lane.b32.xlu1 %v2208_v39, %s1410_s18 }
 0x2d0   :  { %1071 = vrot.lane.b32.xlu0 %v2200_v4, %s1411_s19 }
 0x2d1   :  { %1057 = vrot.lane.b32.xlu1 %v2214_v46, %s1410_s18 }
 0x2d4   :  { %1086 = vperm.xlu0 %1402, %v1083_v6  }
 0x2d5   :  { %1069 = vrot.lane.b32.xlu1 %v2208_v39, %s1411_s19 }
 0x2d9   :  { %1073 = vrot.lane.b32.xlu1 %v2214_v46, %s1411_s19 }
 0x30a   :  { %v960_v21 = vpop.permute.xlu0 %959 }
 0x30b   :  { %v956_v33 = vpop.permute.xlu1 %955 }
 0x30e   :  { %v972_v14 = vpop.permute.xlu0 %971 }
 0x30f   :  { %v958_v2 = vpop.permute.xlu1 %957 }
 0x310   :  { %v965_v18 = vsel %vm224_vm1, %v956_v33, %v958_v2  ;;  %v964_v5 = vsel %vm224_vm1, %v958_v2, %v960_v21 }
 0x311   :  { %v968_v49 = vmul.f32 %v965_v18, %v1593_v48  ;;  %v969_v6 = vmul.f32 %v964_v5, %v1598_v50 }
 0x312   :  { %v976_v41 = vpop.permute.xlu0 %975 }
 0x313   :  { %v962_v15 = vpop.permute.xlu1 %961 }
 0x314   :  { %v963_v24 = vsel %vm224_vm1, %v960_v21, %v962_v15  ;;  %v966_v17 = vsel %vm224_vm1, %v962_v15, %v956_v33 }
 0x315   :  { %v967_v26 = vmul.f32 %v966_v17, %v2511_v31  ;;  %v970_v38 = vmul.f32 %v963_v24, %v2512_v20 }
 0x316   :  { %v988_v27 = vpop.permute.xlu0 %987 }
 0x317   :  { %v974_v63 = vpop.permute.xlu1 %973 }
 0x318   :  { %v981_v3 = vsel %vm262_vm2, %v972_v14, %v974_v63  ;;  %v980_v34 = vsel %vm262_vm2, %v974_v63, %v976_v41 }
 0x319   :  { %v984_v13 = vmul.f32 %v981_v3, %v2509_v29  ;;  %v985_v61 = vmul.f32 %v980_v34, %v2510_v22 }
 0x31a   :  { %v992_v1 = vpop.permute.xlu0 %991 }
 0x31b   :  { %v978_v60 = vpop.permute.xlu1 %977  ;;  %v1356_v0 = vpack.c.bf16 %v984_v13, %v968_v49  ;;  %v1374_v15 = vpack.c.bf16 %v985_v61, %v969_v6 }
 0x31c   :  { %v979_v48 = vsel %vm262_vm2, %v976_v41, %v978_v60  ;;  %v982_v9 = vsel %vm262_vm2, %v978_v60, %v972_v14 }
 0x31d   :  { %v983_v16 = vmul.f32 %v982_v9, %v2513_v25  ;;  %v986_v11 = vmul.f32 %v979_v48, %v2514_v43  ;;  %1357 = vmatprep.subr.bf16.mxu0 %v1356_v0 }
 0x31e   :  { %v1004_v44 = vpop.permute.xlu0 %1003 }
 0x31f   :  { %v1358_v21 = vpack.c.bf16 %v983_v16, %v967_v26  ;;  %v990_v33 = vpop.permute.xlu1 %989  ;;  %v1372_v2 = vpack.c.bf16 %v986_v11, %v970_v38 }
 0x320   :  { %v997_v63 = vsel %vm300_vm3, %v988_v27, %v990_v33  ;;  %v996_v5 = vsel %vm300_vm3, %v990_v33, %v992_v1 }
 0x321   :  { %1359 = vmatpush1.bf16.msra.mxu0 %v1358_v21  ;;  %1373 = vmatprep.subr.bf16.mxu1 %v1372_v2  ;;  %v1000_v34 = vmul.f32 %v997_v63, %v1863_v10  ;;  %v1001_v31 = vmul.f32 %v996_v5, %v1866_v52 }
 0x322   :  { %v1008_v41 = vpop.permute.xlu0 %1007  ;;  %1375 = vmatpush1.bf16.msra.mxu1 %v1374_v15 }
 0x323   :  { %v994_v14 = vpop.permute.xlu1 %993 }
 0x324   :  { %v995_v24 = vsel %vm300_vm3, %v992_v1, %v994_v14  ;;  %v998_v17 = vsel %vm300_vm3, %v994_v14, %v988_v27 }
 0x325   :  { %v999_v61 = vmul.f32 %v998_v17, %v1802_v40  ;;  %v1002_v48 = vmul.f32 %v995_v24, %v1853_v23 }
 0x326   :  { %v1020_v18 = vpop.permute.xlu0 %1019 }
 0x327   :  { %v1006_v3 = vpop.permute.xlu1 %1005 }
 0x328   :  { %v1013_v49 = vsel %vm338_vm4, %v1004_v44, %v1006_v3  ;;  %v1012_v50 = vsel %vm338_vm4, %v1006_v3, %v1008_v41 }
 0x329   :  { %v1016_v29 = vmul.f32 %v1013_v49, %v2485_v36  ;;  %v1017_v22 = vmul.f32 %v1012_v50, %v2486_v53 }
 0x32a   :  { %v1024_v13 = vpop.permute.xlu0 %1023 }
 0x32b   :  { %v1010_v60 = vpop.permute.xlu1 %1009  ;;  %v1360_v0 = vpack.c.bf16 %v1016_v29, %v1000_v34  ;;  %v1378_v38 = vpack.c.bf16 %v1017_v22, %v1001_v31 }
 0x32c   :  { %v1011_v10 = vsel %vm338_vm4, %v1008_v41, %v1010_v60  ;;  %v1014_v36 = vsel %vm338_vm4, %v1010_v60, %v1004_v44 }
 0x32d   :  { %v1015_v9 = vmul.f32 %v1014_v36, %v1805_v42  ;;  %v1018_v27 = vmul.f32 %v1011_v10, %v1888_v19  ;;  %1361 = vmatprep.subr.bf16.mxu0 %v1360_v0 }
 0x32e   :  { %v1036_v1 = vpop.permute.xlu0 %1035 }
 0x32f   :  { %v1362_v26 = vpack.c.bf16 %v1015_v9, %v999_v61  ;;  %v1022_v53 = vpop.permute.xlu1 %1021  ;;  %v1376_v20 = vpack.c.bf16 %v1018_v27, %v1002_v48 }
 0x330   :  { %v1028_v25 = vsel %vm376_vm5, %v1022_v53, %v1024_v13  ;;  %v1029_v40 = vsel %vm376_vm5, %v1020_v18, %v1022_v53 }
 0x331   :  { %v1031_v23 = vmul.f32 %v1029_v40, %v1892_v7  ;;  %v1032_v42 = vmul.f32 %v1028_v25, %v1901_v62  ;;  %1363 = vmatpush1.bf16.msra.mxu0 %v1362_v26  ;;  %1377 = vmatprep.subr.bf16.mxu1 %v1376_v20 }
 0x332   :  { %v1040_v19 = vpop.permute.xlu0 %1039  ;;  %1379 = vmatpush1.bf16.msra.mxu1 %v1378_v38 }
 0x333   :  { %v1366_v52 = vpack.c.bf16 %v1031_v23, %v2202_v45  ;;  %v1026_v16 = vpop.permute.xlu1 %1025  ;;  %v1364_v43 = vpack.c.bf16 %v1032_v42, %v2208_v39 }
 0x334   :  { %v1027_v11 = vsel %vm376_vm5, %v1024_v13, %v1026_v16  ;;  %v1030_v44 = vsel %vm376_vm5, %v1026_v16, %v1020_v18 }
 0x335   :  { %v1033_v6 = vmul.f32 %v1027_v11, %v1904_v8  ;;  %v1034_v7 = vmul.f32 %v1030_v44, %v1907_v37  ;;  %1365 = vmatprep.subr.bf16.mxu0 %v1364_v43 }
 0x336   :  { %v1052_v62 = vpop.permute.xlu0 %1051  ;;  %1367 = vmatpush1.bf16.msra.mxu0 %v1366_v52 }
 0x337   :  { %v1382_v21 = vpack.c.bf16 %v1033_v6, %v2200_v4  ;;  %v1038_v33 = vpop.permute.xlu1 %1037  ;;  %v1380_v45 = vpack.c.bf16 %v1034_v7, %v2214_v46 }
 0x338   :  { %v1044_v15 = vsel %vm414_vm7, %v1038_v33, %v1040_v19  ;;  %v1045_v8 = vsel %vm414_vm7, %v1036_v1, %v1038_v33 }
 0x339   :  { %1381 = vmatprep.subr.bf16.mxu1 %v1380_v45  ;;  %v1047_v14 = vmul.f32 %v1045_v8, %v2476_v51  ;;  %v1048_v46 = vmul.f32 %v1044_v15, %v1922_v58 }
 0x33a   :  { %1383 = vmatpush1.bf16.msra.mxu1 %v1382_v21  ;;  %v1056_v39 = vpop.permute.xlu0 %1055 }
 0x33b   :  { %v1042_v2 = vpop.permute.xlu1 %1041 }
 0x33c   :  { %v1043_v49 = vsel %vm414_vm7, %v1040_v19, %v1042_v2  ;;  %v1046_v34 = vsel %vm414_vm7, %v1042_v2, %v1036_v1 }
 0x33d   :  { %v1049_v51 = vmul.f32 %v1043_v49, %v2044_v28 }
 0x33e   :  { %v1068_v18 = vpop.permute.xlu0 %1067 }
 0x33f   :  { %v1054_v41 = vpop.permute.xlu1 %1053 }
 0x340   :  { %v1060_v37 = vsel %vm452_vm6, %v1054_v41, %v1056_v39  ;;  %v1061_v4 = vsel %vm452_vm6, %v1052_v62, %v1054_v41 }
 0x341   :  { %v1063_v63 = vmul.f32 %v1061_v4, %v1932_v54  ;;  %v1064_v3 = vmul.f32 %v1060_v37, %v1940_v55  ;;  %v1050_v54 = vmul.f32 %v1046_v34, %v1928_v57 }
 0x342   :  { %v1072_v5 = vpop.permute.xlu0 %1071 }
 0x343   :  { %v1370_v50 = vpack.c.bf16 %v1063_v63, %v1047_v14  ;;  %v1058_v29 = vpop.permute.xlu1 %1057  ;;  %v1368_v13 = vpack.c.bf16 %v1064_v3, %v1048_v46 }
 0x344   :  { %v1059_v24 = vsel %vm452_vm6, %v1056_v39, %v1058_v29  ;;  %v1062_v58 = vsel %vm452_vm6, %v1058_v29, %v1052_v62 }
 0x345   :  { %v1065_v55 = vmul.f32 %v1059_v24, %v1943_v32  ;;  %v1066_v17 = vmul.f32 %v1062_v58, %v1950_v59  ;;  %1369 = vmatprep.subr.bf16.mxu0 %v1368_v13  ;;  %v954_v32 = vld [vmem:[%s2400_s7] sm:$0xff] }
 0x346   :  { %1371 = vmatpush1.bf16.msra.mxu0 %v1370_v50 }
 0x347   :  { %v1386_v60 = vpack.c.bf16 %v1065_v55, %v1049_v51  ;;  %v1070_v0 = vpop.permute.xlu1 %1069  ;;  %v1384_v22 = vpack.c.bf16 %v1066_v17, %v1050_v54 }
 0x348   :  { %v1076_v10 = vsel %vm490_vm8, %v1070_v0, %v1072_v5  ;;  %v1077_v36 = vsel %vm490_vm8, %v1068_v18, %v1070_v0 }
 0x349   :  { %v1079_v28 = vmul.f32 %v1077_v36, %v2072_v30  ;;  %v1080_v57 = vmul.f32 %v1076_v10, %v2061_v12  ;;  %1385 = vmatprep.subr.bf16.mxu1 %v1384_v22 }
 0x34a   :  { %1387 = vmatpush1.bf16.msra.mxu1 %v1386_v60 }
 0x34b   :  { %1108 = vmatprep.subr.mxu0 %v1080_v57  ;;  %v1074_v59 = vpop.permute.xlu1 %1073 }
 0x34c   :  { %v1075_v61 = vsel %vm490_vm8, %v1072_v5, %v1074_v59  ;;  %v1078_v48 = vsel %vm490_vm8, %v1074_v59, %v1068_v18  ;;  %1109 = vmatpush1.msra.mxu0 %v1079_v28 }
 0x34d   :  { %v1081_v9 = vmul.f32 %v1075_v61, %v2077_v56  ;;  %v1082_v30 = vmul.f32 %v1078_v48, %v2064_v47  ;;  %1256 = vmatmul.mubr.msk.f32.vlgmr.msra.gmra.mrb[4].mxu0 %vm649_vm9, %v954_v32 }
 0x34f   :  { %1179 = vmatprep.subr.mxu1 %v1082_v30 }
 0x350   :  { %1180 = vmatpush1.msra.mxu1 %v1081_v9 }
 0x351   :  { %1257 = vmatmul.mubr.msk.f32.vlgmr.msra.gmra.mrb[4].mxu1 %vm649_vm9, %v954_v32 }
 0x353   :  { %v1087_v12 = vpop.permute.xlu0 %1086 }
 0x420   :  { %v1158_v27 = vpop.f32.mrb[4].mxu0 }
 0x421   :  { %v1159_v1 = vadd.f32 %v1158_v27, %v1087_v12  ;;  %v1160_v31 = vpop.f32.mrb[5].mxu0 }
 0x422   :  { %v1161_v26 = vadd.f32 %v1160_v31, %v1087_v12 }
 0x423   :  { %v1234_v53 = vmax.f32 %v1159_v1, 0.0 }
 0x424   :  { %v1235_v20 = vmax.f32 %v1161_v26, 0.0  ;;  %v1229_v35 = vpop.f32.mrb[4].mxu1 }
 0x425   :  { %1238 = vst [vmem:[%s2401_s9] sm:$0xff] %v1234_v53  ;;  %v1230_v56 = vadd.f32 %v1229_v35, %v1087_v12  ;;  %v1231_v47 = vpop.f32.mrb[5].mxu1 }
 0x426   :  { %1239 = vst [vmem:[%s2401_s9 + $0x8] sm:$0xff] %v1235_v20  ;;  %v1232_v38 = vadd.f32 %v1231_v47, %v1087_v12 }
 0x427   :  { %v1236_v25 = vmax.f32 %v1230_v56, 0.0 }
 0x428   :  { %v1237_v40 = vmax.f32 %v1232_v38, 0.0 }
 0x429   :  { %1258 = vst [vmem:[%s2401_s9 + $0x10] sm:$0xff] %v1236_v25 }
 0x42a   :  { %1259 = vst [vmem:[%s2401_s9 + $0x18] sm:$0xff] %v1237_v40 }

</bundles_post_ra>
